<compile_context>
chip_gen: v6e
topology: v6e:2x2x1
jax: 0.10.0
libtpu: 0.0.40
codegen_flags: <defaults>
</compile_context>

<pallas_src>
import jax
import jax.numpy as jnp
from jax.experimental import pallas as pl
from jax.experimental.pallas import tpu as pltpu  # noqa: F401  (TPU-specific tuning hooks)

B = 2          # batch
S = 16         # sequence length
H = 32         # hidden size
NH = 2         # attention heads
HD = H // NH   # head dim
FF = 64        # intermediate (FFN) size
VOCAB = 64
MAX_POS = 32
NLAYERS = 2
LN_EPS = 1e-5
BS = B * S     # flattened (batch*seq) rows used inside the kernel
SCALE = 1.0 / (HD ** 0.5)

# ---- packed-slab geometry (all slabs are 128 lanes wide, lane-dense) ----
WSLAB_ROWS = 3 * H + FF            # per layer: wqkv | wo | w1 | w2 stacked on rows
GSLAB_ROWS = VOCAB + MAX_POS + H   # word_emb | pos_emb | cls_dense
BSLAB_ROWS = 8 + NLAYERS * 8       # 6 global vector rows (+2 pad), then 8 rows/layer


# ----------------------------- in-kernel helpers -----------------------------

def _layer_norm(x, g, b, eps=LN_EPS):
    mu = jnp.mean(x, axis=-1, keepdims=True)
    var = jnp.mean((x - mu) ** 2, axis=-1, keepdims=True)
    return (x - mu) * jax.lax.rsqrt(var + eps) * g + b


def _gelu(x):
    # TODO(synk): HF Roberta uses exact erf-GELU; tanh approximation used here.
    return 0.5 * x * (1.0 + jnp.tanh(0.7978845608028654 * (x + 0.044715 * x * x * x)))


# ------------------------------- fused Pallas kernel --------------------------

def fused_forward_kernel(ids_ref, pid_ref, attn_ref,
                         wslab_ref, gslab_ref, bslab_ref, out_ref):
    """Entire GraphCodeBERT forward for all batch elements in one invocation."""
    sid_col = ids_ref[:, 0:1]                     # (BS,1) int32 source ids
    pid_col = ids_ref[:, 1:2]                     # (BS,1) int32 position ids
    pid = pid_ref[...]                            # (B,S)  int32 position ids
    attn = attn_ref[...]                          # (B,S,S) 0/1 mask

    # ---- embedding lookups fused in-kernel as one-hot MXU matmuls ----
    word_tab = gslab_ref[0:VOCAB, 0:H]                         # (VOCAB,H)
    pos_tab = gslab_ref[VOCAB:VOCAB + MAX_POS, 0:H]            # (MAX_POS,H)
    word_oh = (jax.lax.broadcasted_iota(jnp.int32, (BS, VOCAB), 1)
               == sid_col).astype(jnp.float32)
    pos_oh = (jax.lax.broadcasted_iota(jnp.int32, (BS, MAX_POS), 1)
              == pid_col).astype(jnp.float32)
    emb = jnp.dot(word_oh, word_tab, preferred_element_type=jnp.float32)    # (BS,H)
    pos_emb = jnp.dot(pos_oh, pos_tab, preferred_element_type=jnp.float32)  # (BS,H)

    # ---- graph-guided averaging of token embeddings into DFG-node rows ----
    # NOTE: the nodes-row factor of the PyTorch mask is folded into the final
    # select; identical results because normalization is per-row and non-node
    # rows are discarded by the select.  Keep this invariant on refactor.
    nodes = (pid_col == 0).astype(jnp.float32).reshape(B, S, 1)     # (B,S,1)
    token_row = (pid >= 2).astype(jnp.float32).reshape(B, 1, S)     # (B,1,S)
    emb3 = emb.reshape(B, S, H)
    mask = token_row * attn                                         # (B,S,S)
    denom = jnp.sum(mask, axis=-1, keepdims=True) + 1e-10
    norm = mask * pl.reciprocal(denom, approx=True)
    avg = jnp.einsum('bqk,bkh->bqh', norm, emb3,
                     preferred_element_type=jnp.float32)            # (B,S,H)
    mixed = emb3 * (1.0 - nodes) + avg * nodes                      # (B,S,H)

    # ---- Roberta embeddings: + position emb + token-type emb, LayerNorm ----
    type_emb = bslab_ref[0:1, 0:H]
    x = mixed.reshape(BS, H) + pos_emb + type_emb
    x = _layer_norm(x, bslab_ref[1:2, 0:H], bslab_ref[2:3, 0:H])    # (BS,H)

    # additive (HF-style extended) attention mask, tiled over heads (head-major)
    add_mask = (1.0 - attn) * (-1e9)                                # (B,S,S)
    add_mask_g = jnp.concatenate([add_mask] * NH, axis=0)           # (NH*B,S,S)

    # ---- encoder layers (post-LN), static loop, weights sliced from the slab ----
    for l in range(NLAYERS):
        wqkv = wslab_ref[l, 0:H, :]                      # (H,128) Q pre-scaled, lanes 96:128 zero
        wo = wslab_ref[l, H:2 * H, 0:H]                  # (H,H)
        w1 = wslab_ref[l, 2 * H:3 * H, 0:FF]             # (H,FF)
        w2 = wslab_ref[l, 3 * H:3 * H + FF, 0:H]         # (FF,H)
        base = 8 + l * 8
        bqkv = bslab_ref[base:base + 1, :]               # (1,128) Q part pre-scaled
        bo = bslab_ref[base + 1:base + 2, 0:H]
        g1 = bslab_ref[base + 2:base + 3, 0:H]
        be1 = bslab_ref[base + 3:base + 4, 0:H]
        b1 = bslab_ref[base + 4:base + 5, 0:FF]
        b2 = bslab_ref[base + 5:base + 6, 0:H]
        g2 = bslab_ref[base + 6:base + 7, 0:H]
        be2 = bslab_ref[base + 7:base + 8, 0:H]

        # packed QKV projection: one (BS,H)x(H,128) matmul, lane-dense output
        qkv = jnp.dot(x, wqkv, preferred_element_type=jnp.float32) + bqkv   # (BS,128)

        def fold_heads(off):
            # (BS, NH*HD) lane block -> (NH*B, S, HD): heads folded on leading axis
            return jnp.concatenate(
                [qkv[:, off + h * HD:off + (h + 1) * HD].reshape(B, S, HD)
                 for h in range(NH)], axis=0)

        q = fold_heads(0)
        k = fold_heads(H)
        v = fold_heads(2 * H)

        # ONE scores einsum + ONE softmax for all heads (1/sqrt(HD) folded into Wq)
        scores = jnp.einsum('gqd,gkd->gqk', q, k,
                            preferred_element_type=jnp.float32) + add_mask_g
        m = jnp.max(scores, axis=-1, keepdims=True)
        e = jnp.exp(scores - m)
        p = e * pl.reciprocal(jnp.sum(e, axis=-1, keepdims=True), approx=True)
        ctx = jnp.einsum('gqk,gkd->gqd', p, v,
                         preferred_element_type=jnp.float32)        # (NH*B,S,HD)

        # merge heads by accumulating per-head output projections (no lane concat)
        attn_out = bo
        for h in range(NH):
            attn_out = attn_out + jnp.dot(
                ctx[h * B:(h + 1) * B].reshape(BS, HD),
                wo[h * HD:(h + 1) * HD, :],
                preferred_element_type=jnp.float32)
        x = _layer_norm(x + attn_out, g1, be1)

        hmid = _gelu(jnp.dot(x, w1, preferred_element_type=jnp.float32) + b1)
        ffn = jnp.dot(hmid, w2, preferred_element_type=jnp.float32) + b2
        x = _layer_norm(x + ffn, g2, be2)

    # ---- classification head on the CLS token (dropout = identity) ----
    feat = x.reshape(B, S, H)[:, 0, :]                               # (B,H)
    cls_wd = gslab_ref[VOCAB + MAX_POS:VOCAB + MAX_POS + H, 0:H]     # (H,H)
    t = jnp.tanh(jnp.dot(feat, cls_wd, preferred_element_type=jnp.float32)
                 + bslab_ref[3:4, 0:H])
    wp_row = bslab_ref[4:5, 0:H]                                     # (1,H) = out_proj W^T
    out_ref[...] = (jnp.sum(t * wp_row, axis=-1, keepdims=True)
                    + bslab_ref[5:6, 0:1])                           # (B,1)


# ------------------------------ pallas_call wrapper ----------------------------

def fused_forward(ids_col, position_idx, attn_f, packed):
    # No grid / BlockSpecs: a single invocation; the 6 inputs (~250 KB total,
    # three of them packed lane-dense slabs) reside whole in VMEM.
    return pl.pallas_call(
        fused_forward_kernel,
        out_shape=jax.ShapeDtypeStruct((B, 1), jnp.float32),
    )(ids_col, position_idx, attn_f,
      packed["wslab"], packed["gslab"], packed["bslab"])


# --------------------------------- parameters ---------------------------------

def init_params(key):
    keys = iter(jax.random.split(key, 64))

    def nrm(shape, scale=0.02):
        return (scale * jax.random.normal(next(keys), shape)).astype(jnp.float32)

    def stack(make):
        return jnp.stack([make() for _ in range(NLAYERS)], axis=0)

    params = {
        "word_emb": nrm((VOCAB, H)),
        "pos_emb": nrm((MAX_POS, H)),
        "type_emb": nrm((1, H)),
        "emb_ln_g": jnp.ones((1, H), jnp.float32),
        "emb_ln_b": jnp.zeros((1, H), jnp.float32),
        "cls_wd": nrm((H, H)),
        "cls_bd": jnp.zeros((1, H), jnp.float32),
        "cls_wp": nrm((H, 1)),
        "cls_bp": jnp.zeros((1, 1), jnp.float32),
        # per-layer weights, stacked over layers; QKV packed into one matrix
        "wqkv": stack(lambda: nrm((H, 3 * H))),
        "bqkv": jnp.zeros((NLAYERS, 1, 3 * H), jnp.float32),
        "wo":   stack(lambda: nrm((H, H))),
        "bo":   jnp.zeros((NLAYERS, 1, H), jnp.float32),
        "g1":   jnp.ones((NLAYERS, 1, H), jnp.float32),
        "be1":  jnp.zeros((NLAYERS, 1, H), jnp.float32),
        "w1":   stack(lambda: nrm((H, FF))),
        "b1":   jnp.zeros((NLAYERS, 1, FF), jnp.float32),
        "w2":   stack(lambda: nrm((FF, H))),
        "b2":   jnp.zeros((NLAYERS, 1, H), jnp.float32),
        "g2":   jnp.ones((NLAYERS, 1, H), jnp.float32),
        "be2":  jnp.zeros((NLAYERS, 1, H), jnp.float32),
    }
    return params


def pack_params(p):
    """Pack logical parameters into three lane-dense (.., rows, 128) f32 slabs.

    The 1/sqrt(HD) attention scale is folded into the Q columns of wqkv / bqkv.
    """
    # weight slab, per layer rows: wqkv(0:H) | wo(H:2H) | w1(2H:3H) | w2(3H:3H+FF)
    wslab = jnp.zeros((NLAYERS, WSLAB_ROWS, 128), jnp.float32)
    for l in range(NLAYERS):
        wqkv = p["wqkv"][l].at[:, :H].multiply(SCALE)          # pre-scale Q columns
        wslab = wslab.at[l, 0:H, 0:3 * H].set(wqkv)
        wslab = wslab.at[l, H:2 * H, 0:H].set(p["wo"][l])
        wslab = wslab.at[l, 2 * H:3 * H, 0:FF].set(p["w1"][l])
        wslab = wslab.at[l, 3 * H:3 * H + FF, 0:H].set(p["w2"][l])

    # globals slab: word_emb | pos_emb | classifier dense weight
    gslab = jnp.zeros((GSLAB_ROWS, 128), jnp.float32)
    gslab = gslab.at[0:VOCAB, 0:H].set(p["word_emb"])
    gslab = gslab.at[VOCAB:VOCAB + MAX_POS, 0:H].set(p["pos_emb"])
    gslab = gslab.at[VOCAB + MAX_POS:VOCAB + MAX_POS + H, 0:H].set(p["cls_wd"])

    # bias / LayerNorm slab: 6 global rows (+2 pad), then 8 rows per layer
    bslab = jnp.zeros((BSLAB_ROWS, 128), jnp.float32)
    bslab = bslab.at[0, 0:H].set(p["type_emb"][0])
    bslab = bslab.at[1, 0:H].set(p["emb_ln_g"][0])
    bslab = bslab.at[2, 0:H].set(p["emb_ln_b"][0])
    bslab = bslab.at[3, 0:H].set(p["cls_bd"][0])
    bslab = bslab.at[4, 0:H].set(p["cls_wp"][:, 0])
    bslab = bslab.at[5, 0:1].set(p["cls_bp"][0])
    for l in range(NLAYERS):
        base = 8 + l * 8
        bqkv = p["bqkv"][l, 0].at[:H].multiply(SCALE)          # pre-scale Q bias
        bslab = bslab.at[base + 0, 0:3 * H].set(bqkv)
        bslab = bslab.at[base + 1, 0:H].set(p["bo"][l, 0])
        bslab = bslab.at[base + 2, 0:H].set(p["g1"][l, 0])
        bslab = bslab.at[base + 3, 0:H].set(p["be1"][l, 0])
        bslab = bslab.at[base + 4, 0:FF].set(p["b1"][l, 0])
        bslab = bslab.at[base + 5, 0:H].set(p["b2"][l, 0])
        bslab = bslab.at[base + 6, 0:H].set(p["g2"][l, 0])
        bslab = bslab.at[base + 7, 0:H].set(p["be2"][l, 0])

    return {"wslab": wslab, "gslab": gslab, "bslab": bslab}


# ---------------------------------- forward -----------------------------------

@jax.jit
def model_forward(packed, source_ids, position_idx, attn_mask, labels=None):
    # Only wrapper-side glue: flatten/stack the tiny id vectors and cast the mask.
    # All gathers, mask construction, encoder layers and the head run in the kernel.
    ids_col = jnp.stack([source_ids.reshape(-1).astype(jnp.int32),
                         position_idx.reshape(-1).astype(jnp.int32)], axis=-1)  # (BS,2)
    logits = fused_forward(ids_col, position_idx.astype(jnp.int32),
                           attn_mask.astype(jnp.float32), packed)

    if labels is not None:
        return jnp.mean((logits - labels[:, None].astype(jnp.float32)) ** 2)
    return logits


# ------------------------------------ main -------------------------------------

if __name__ == "__main__":
    key = jax.random.PRNGKey(0)
    kp, ks, ka = jax.random.split(key, 3)
    params = init_params(kp)
    packed = pack_params(params)

    source_ids = jax.random.randint(ks, (B, S), 0, VOCAB, dtype=jnp.int32)
    # GraphCodeBERT convention: code/text tokens get positions >= 2,
    # DFG nodes get position 0, padding gets position 1.
    pos_row = jnp.concatenate([jnp.arange(2, 12, dtype=jnp.int32),
                               jnp.zeros((4,), jnp.int32),
                               jnp.ones((2,), jnp.int32)])
    position_idx = jnp.tile(pos_row[None, :], (B, 1))
    rand_mask = (jax.random.uniform(ka, (B, S, S)) > 0.3).astype(jnp.float32)
    attn_mask = jnp.clip(rand_mask + jnp.eye(S, dtype=jnp.float32)[None], 0.0, 1.0)

    logits = model_forward(packed, source_ids, position_idx, attn_mask)
    jax.block_until_ready(logits)
    assert logits.shape == (B, 1) and logits.dtype == jnp.float32

    # regression-loss path (labels given)
    labels = jnp.array([0.5, 0.7], dtype=jnp.float32)
    loss = model_forward(packed, source_ids, position_idx, attn_mask, labels=labels)
    jax.block_until_ready(loss)

    print("KERNEL_OK")
</pallas_src>

<mosaic_0001>
module attributes {stable_mosaic.version = 11 : i64} {
  func.func @fused_forward_kernel(%arg0: memref<32x2xi32, #tpu.memory_space<vmem>>, %arg1: memref<2x16xi32, #tpu.memory_space<vmem>>, %arg2: memref<2x16x16xf32, #tpu.memory_space<vmem>>, %arg3: memref<2x160x128xf32, #tpu.memory_space<vmem>>, %arg4: memref<128x128xf32, #tpu.memory_space<vmem>>, %arg5: memref<24x128xf32, #tpu.memory_space<vmem>>, %arg6: memref<2x1xf32, #tpu.memory_space<vmem>>) attributes {dimension_semantics = [], scalar_prefetch = 0 : i64, scratch_operands = 0 : i64, tpu.core_type = #tpu.core_type<tc>} {
    %c0 = arith.constant 0 : index
    %c0_0 = arith.constant 0 : index
    %0 = vector.load %arg0[%c0, %c0_0] : memref<32x2xi32, #tpu.memory_space<vmem>>, vector<32x1xi32>
    %c0_1 = arith.constant 0 : index
    %c1 = arith.constant 1 : index
    %1 = vector.load %arg0[%c0_1, %c1] : memref<32x2xi32, #tpu.memory_space<vmem>>, vector<32x1xi32>
    %c0_2 = arith.constant 0 : index
    %c0_3 = arith.constant 0 : index
    %2 = vector.load %arg1[%c0_2, %c0_3] : memref<2x16xi32, #tpu.memory_space<vmem>>, vector<2x16xi32>
    %c0_4 = arith.constant 0 : index
    %c0_5 = arith.constant 0 : index
    %c0_6 = arith.constant 0 : index
    %3 = vector.load %arg2[%c0_4, %c0_5, %c0_6] : memref<2x16x16xf32, #tpu.memory_space<vmem>>, vector<2x16x16xf32>
    %c0_7 = arith.constant 0 : index
    %c0_8 = arith.constant 0 : index
    %4 = vector.load %arg4[%c0_7, %c0_8] : memref<128x128xf32, #tpu.memory_space<vmem>>, vector<64x32xf32>
    %c64 = arith.constant 64 : index
    %c0_9 = arith.constant 0 : index
    %5 = vector.load %arg4[%c64, %c0_9] : memref<128x128xf32, #tpu.memory_space<vmem>>, vector<32x32xf32>
    %6 = tpu.iota {dimensions = array<i32: 1>} : vector<32x64xi32>
    %7 = vector.broadcast %0 : vector<32x1xi32> to vector<32x64xi32>
    %8 = arith.cmpi eq, %6, %7 : vector<32x64xi32>
    %9 = arith.extui %8 : vector<32x64xi1> to vector<32x64xi32>
    %10 = arith.sitofp %9 : vector<32x64xi32> to vector<32x64xf32>
    %11 = tpu.iota {dimensions = array<i32: 1>} : vector<32x32xi32>
    %12 = vector.broadcast %1 : vector<32x1xi32> to vector<32x32xi32>
    %13 = arith.cmpi eq, %11, %12 : vector<32x32xi32>
    %14 = arith.extui %13 : vector<32x32xi1> to vector<32x32xi32>
    %15 = arith.sitofp %14 : vector<32x32xi32> to vector<32x32xf32>
    %cst = arith.constant dense<0.000000e+00> : vector<32x32xf32>
    %16 = tpu.matmul %10, %4, %cst {dimension_numbers = #tpu.dot_dimension_numbers<[1], [0], [0], [1], [0, 0, 1, 1], [], []>} : vector<32x64xf32>, vector<64x32xf32>, vector<32x32xf32> -> vector<32x32xf32>
    %cst_10 = arith.constant dense<0.000000e+00> : vector<32x32xf32>
    %17 = tpu.matmul %15, %5, %cst_10 {dimension_numbers = #tpu.dot_dimension_numbers<[1], [0], [0], [1], [0, 0, 1, 1], [], []>} : vector<32x32xf32>, vector<32x32xf32>, vector<32x32xf32> -> vector<32x32xf32>
    %c0_i32 = arith.constant 0 : i32
    %18 = vector.broadcast %c0_i32 : i32 to vector<32x1xi32>
    %19 = arith.cmpi eq, %1, %18 : vector<32x1xi32>
    %20 = arith.extui %19 : vector<32x1xi1> to vector<32x1xi32>
    %21 = arith.sitofp %20 : vector<32x1xi32> to vector<32x1xf32>
    %22 = vector.shape_cast %21 : vector<32x1xf32> to vector<2x16x1xf32>
    %c2_i32 = arith.constant 2 : i32
    %23 = vector.broadcast %c2_i32 : i32 to vector<2x16xi32>
    %24 = arith.cmpi sge, %2, %23 : vector<2x16xi32>
    %25 = arith.extui %24 : vector<2x16xi1> to vector<2x16xi32>
    %26 = arith.sitofp %25 : vector<2x16xi32> to vector<2x16xf32>
    %27 = vector.shape_cast %26 : vector<2x16xf32> to vector<2x1x16xf32>
    %28 = vector.shape_cast %16 : vector<32x32xf32> to vector<2x16x32xf32>
    %29 = vector.broadcast %27 : vector<2x1x16xf32> to vector<2x16x16xf32>
    %30 = arith.mulf %29, %3 : vector<2x16x16xf32>
    %cst_11 = arith.constant dense<0.000000e+00> : vector<2x16xf32>
    %31 = vector.multi_reduction <add>, %30, %cst_11 [2] : vector<2x16x16xf32> to vector<2x16xf32>
    %32 = vector.shape_cast %31 : vector<2x16xf32> to vector<2x16x1xf32>
    %cst_12 = arith.constant 1.000000e-10 : f32
    %33 = vector.broadcast %cst_12 : f32 to vector<2x16x1xf32>
    %34 = arith.addf %32, %33 : vector<2x16x1xf32>
    %35 = tpu.reciprocal %34 {approx = true} : vector<2x16x1xf32> -> vector<2x16x1xf32>
    %36 = vector.broadcast %35 : vector<2x16x1xf32> to vector<2x16x16xf32>
    %37 = arith.mulf %30, %36 : vector<2x16x16xf32>
    "tpu.trace_start"() <{level = 10 : i32, message = "bqk,bkh->bqh"}> : () -> ()
    %cst_13 = arith.constant dense<0.000000e+00> : vector<2x16x32xf32>
    %38 = tpu.matmul %37, %28, %cst_13 {dimension_numbers = #tpu.dot_dimension_numbers<[2], [1], [1], [2], [0, 0, 0, 1, 1, 2], [0], [0]>} : vector<2x16x16xf32>, vector<2x16x32xf32>, vector<2x16x32xf32> -> vector<2x16x32xf32>
    "tpu.trace_stop"() : () -> ()
    %cst_14 = arith.constant 1.000000e+00 : f32
    %39 = vector.broadcast %cst_14 : f32 to vector<2x16x1xf32>
    %40 = arith.subf %39, %22 : vector<2x16x1xf32>
    %41 = vector.broadcast %40 : vector<2x16x1xf32> to vector<2x16x32xf32>
    %42 = arith.mulf %28, %41 : vector<2x16x32xf32>
    %43 = vector.broadcast %22 : vector<2x16x1xf32> to vector<2x16x32xf32>
    %44 = arith.mulf %38, %43 : vector<2x16x32xf32>
    %45 = arith.addf %42, %44 : vector<2x16x32xf32>
    %c0_15 = arith.constant 0 : index
    %c0_16 = arith.constant 0 : index
    %46 = vector.load %arg5[%c0_15, %c0_16] : memref<24x128xf32, #tpu.memory_space<vmem>>, vector<1x32xf32>
    %47 = vector.shape_cast %45 : vector<2x16x32xf32> to vector<32x32xf32>
    %48 = arith.addf %47, %17 : vector<32x32xf32>
    %49 = vector.broadcast %46 : vector<1x32xf32> to vector<32x32xf32>
    %50 = arith.addf %48, %49 : vector<32x32xf32>
    %c1_17 = arith.constant 1 : index
    %c0_18 = arith.constant 0 : index
    %51 = vector.load %arg5[%c1_17, %c0_18] : memref<24x128xf32, #tpu.memory_space<vmem>>, vector<1x32xf32>
    %c2 = arith.constant 2 : index
    %c0_19 = arith.constant 0 : index
    %52 = vector.load %arg5[%c2, %c0_19] : memref<24x128xf32, #tpu.memory_space<vmem>>, vector<1x32xf32>
    %cst_20 = arith.constant dense<0.000000e+00> : vector<32xf32>
    %53 = vector.multi_reduction <add>, %50, %cst_20 [1] : vector<32x32xf32> to vector<32xf32>
    %54 = vector.shape_cast %53 : vector<32xf32> to vector<32x1xf32>
    %cst_21 = arith.constant 3.200000e+01 : f32
    %55 = vector.broadcast %cst_21 : f32 to vector<32x1xf32>
    %56 = arith.divf %54, %55 : vector<32x1xf32>
    %57 = vector.broadcast %56 : vector<32x1xf32> to vector<32x32xf32>
    %58 = arith.subf %50, %57 : vector<32x32xf32>
    %59 = arith.mulf %58, %58 : vector<32x32xf32>
    %cst_22 = arith.constant dense<0.000000e+00> : vector<32xf32>
    %60 = vector.multi_reduction <add>, %59, %cst_22 [1] : vector<32x32xf32> to vector<32xf32>
    %61 = vector.shape_cast %60 : vector<32xf32> to vector<32x1xf32>
    %cst_23 = arith.constant 3.200000e+01 : f32
    %62 = vector.broadcast %cst_23 : f32 to vector<32x1xf32>
    %63 = arith.divf %61, %62 : vector<32x1xf32>
    %64 = vector.broadcast %56 : vector<32x1xf32> to vector<32x32xf32>
    %65 = arith.subf %50, %64 : vector<32x32xf32>
    %cst_24 = arith.constant 9.99999974E-6 : f32
    %66 = vector.broadcast %cst_24 : f32 to vector<32x1xf32>
    %67 = arith.addf %63, %66 : vector<32x1xf32>
    %68 = math.rsqrt %67 : vector<32x1xf32>
    %69 = vector.broadcast %68 : vector<32x1xf32> to vector<32x32xf32>
    %70 = arith.mulf %65, %69 : vector<32x32xf32>
    %71 = vector.broadcast %51 : vector<1x32xf32> to vector<32x32xf32>
    %72 = arith.mulf %70, %71 : vector<32x32xf32>
    %73 = vector.broadcast %52 : vector<1x32xf32> to vector<32x32xf32>
    %74 = arith.addf %72, %73 : vector<32x32xf32>
    %cst_25 = arith.constant 1.000000e+00 : f32
    %75 = vector.broadcast %cst_25 : f32 to vector<2x16x16xf32>
    %76 = arith.subf %75, %3 : vector<2x16x16xf32>
    %cst_26 = arith.constant -1.000000e+09 : f32
    %77 = vector.broadcast %cst_26 : f32 to vector<2x16x16xf32>
    %78 = arith.mulf %76, %77 : vector<2x16x16xf32>
    %79 = tpu.concatenate %78, %78 in 0 : vector<2x16x16xf32>, vector<2x16x16xf32> -> vector<4x16x16xf32>
    %c0_27 = arith.constant 0 : index
    %c0_28 = arith.constant 0 : index
    %c0_29 = arith.constant 0 : index
    %80 = vector.load %arg3[%c0_27, %c0_28, %c0_29] : memref<2x160x128xf32, #tpu.memory_space<vmem>>, vector<1x32x128xf32>
    %81 = vector.shape_cast %80 : vector<1x32x128xf32> to vector<32x128xf32>
    %c0_30 = arith.constant 0 : index
    %c32 = arith.constant 32 : index
    %c0_31 = arith.constant 0 : index
    %82 = vector.load %arg3[%c0_30, %c32, %c0_31] : memref<2x160x128xf32, #tpu.memory_space<vmem>>, vector<1x32x32xf32>
    %83 = vector.shape_cast %82 : vector<1x32x32xf32> to vector<32x32xf32>
    %c0_32 = arith.constant 0 : index
    %c64_33 = arith.constant 64 : index
    %c0_34 = arith.constant 0 : index
    %84 = vector.load %arg3[%c0_32, %c64_33, %c0_34] : memref<2x160x128xf32, #tpu.memory_space<vmem>>, vector<1x32x64xf32>
    %85 = vector.shape_cast %84 : vector<1x32x64xf32> to vector<32x64xf32>
    %c0_35 = arith.constant 0 : index
    %c96 = arith.constant 96 : index
    %c0_36 = arith.constant 0 : index
    %86 = vector.load %arg3[%c0_35, %c96, %c0_36] : memref<2x160x128xf32, #tpu.memory_space<vmem>>, vector<1x64x32xf32>
    %87 = vector.shape_cast %86 : vector<1x64x32xf32> to vector<64x32xf32>
    %c8 = arith.constant 8 : index
    %c0_37 = arith.constant 0 : index
    %88 = vector.load %arg5[%c8, %c0_37] : memref<24x128xf32, #tpu.memory_space<vmem>>, vector<1x128xf32>
    %c9 = arith.constant 9 : index
    %c0_38 = arith.constant 0 : index
    %89 = vector.load %arg5[%c9, %c0_38] : memref<24x128xf32, #tpu.memory_space<vmem>>, vector<1x32xf32>
    %c10 = arith.constant 10 : index
    %c0_39 = arith.constant 0 : index
    %90 = vector.load %arg5[%c10, %c0_39] : memref<24x128xf32, #tpu.memory_space<vmem>>, vector<1x32xf32>
    %c11 = arith.constant 11 : index
    %c0_40 = arith.constant 0 : index
    %91 = vector.load %arg5[%c11, %c0_40] : memref<24x128xf32, #tpu.memory_space<vmem>>, vector<1x32xf32>
    %c12 = arith.constant 12 : index
    %c0_41 = arith.constant 0 : index
    %92 = vector.load %arg5[%c12, %c0_41] : memref<24x128xf32, #tpu.memory_space<vmem>>, vector<1x64xf32>
    %c13 = arith.constant 13 : index
    %c0_42 = arith.constant 0 : index
    %93 = vector.load %arg5[%c13, %c0_42] : memref<24x128xf32, #tpu.memory_space<vmem>>, vector<1x32xf32>
    %c14 = arith.constant 14 : index
    %c0_43 = arith.constant 0 : index
    %94 = vector.load %arg5[%c14, %c0_43] : memref<24x128xf32, #tpu.memory_space<vmem>>, vector<1x32xf32>
    %c15 = arith.constant 15 : index
    %c0_44 = arith.constant 0 : index
    %95 = vector.load %arg5[%c15, %c0_44] : memref<24x128xf32, #tpu.memory_space<vmem>>, vector<1x32xf32>
    %cst_45 = arith.constant dense<0.000000e+00> : vector<32x128xf32>
    %96 = tpu.matmul %74, %81, %cst_45 {dimension_numbers = #tpu.dot_dimension_numbers<[1], [0], [0], [1], [0, 0, 1, 1], [], []>} : vector<32x32xf32>, vector<32x128xf32>, vector<32x128xf32> -> vector<32x128xf32>
    %97 = vector.broadcast %88 : vector<1x128xf32> to vector<32x128xf32>
    %98 = arith.addf %96, %97 : vector<32x128xf32>
    %99 = vector.extract_strided_slice %98 {offsets = [0, 0], sizes = [32, 16], strides = [1, 1]} : vector<32x128xf32> to vector<32x16xf32>
    %100 = vector.shape_cast %99 : vector<32x16xf32> to vector<2x16x16xf32>
    %101 = vector.extract_strided_slice %98 {offsets = [0, 16], sizes = [32, 16], strides = [1, 1]} : vector<32x128xf32> to vector<32x16xf32>
    %102 = vector.shape_cast %101 : vector<32x16xf32> to vector<2x16x16xf32>
    %103 = tpu.concatenate %100, %102 in 0 : vector<2x16x16xf32>, vector<2x16x16xf32> -> vector<4x16x16xf32>
    %104 = vector.extract_strided_slice %98 {offsets = [0, 32], sizes = [32, 16], strides = [1, 1]} : vector<32x128xf32> to vector<32x16xf32>
    %105 = vector.shape_cast %104 : vector<32x16xf32> to vector<2x16x16xf32>
    %106 = vector.extract_strided_slice %98 {offsets = [0, 48], sizes = [32, 16], strides = [1, 1]} : vector<32x128xf32> to vector<32x16xf32>
    %107 = vector.shape_cast %106 : vector<32x16xf32> to vector<2x16x16xf32>
    %108 = tpu.concatenate %105, %107 in 0 : vector<2x16x16xf32>, vector<2x16x16xf32> -> vector<4x16x16xf32>
    %109 = vector.extract_strided_slice %98 {offsets = [0, 64], sizes = [32, 16], strides = [1, 1]} : vector<32x128xf32> to vector<32x16xf32>
    %110 = vector.shape_cast %109 : vector<32x16xf32> to vector<2x16x16xf32>
    %111 = vector.extract_strided_slice %98 {offsets = [0, 80], sizes = [32, 16], strides = [1, 1]} : vector<32x128xf32> to vector<32x16xf32>
    %112 = vector.shape_cast %111 : vector<32x16xf32> to vector<2x16x16xf32>
    %113 = tpu.concatenate %110, %112 in 0 : vector<2x16x16xf32>, vector<2x16x16xf32> -> vector<4x16x16xf32>
    "tpu.trace_start"() <{level = 10 : i32, message = "gqd,gkd->gqk"}> : () -> ()
    %cst_46 = arith.constant dense<0.000000e+00> : vector<4x16x16xf32>
    %114 = tpu.matmul %103, %108, %cst_46 {dimension_numbers = #tpu.dot_dimension_numbers<[2], [2], [1], [1], [0, 0, 0, 1, 1, 1], [0], [0]>} : vector<4x16x16xf32>, vector<4x16x16xf32>, vector<4x16x16xf32> -> vector<4x16x16xf32>
    "tpu.trace_stop"() : () -> ()
    %115 = arith.addf %114, %79 : vector<4x16x16xf32>
    %cst_47 = arith.constant dense<0xFF800000> : vector<4x16xf32>
    %116 = vector.multi_reduction <maximumf>, %115, %cst_47 [2] : vector<4x16x16xf32> to vector<4x16xf32>
    %117 = vector.shape_cast %116 : vector<4x16xf32> to vector<4x16x1xf32>
    %118 = vector.broadcast %117 : vector<4x16x1xf32> to vector<4x16x16xf32>
    %119 = arith.subf %115, %118 : vector<4x16x16xf32>
    %120 = math.exp %119 : vector<4x16x16xf32>
    %cst_48 = arith.constant dense<0.000000e+00> : vector<4x16xf32>
    %121 = vector.multi_reduction <add>, %120, %cst_48 [2] : vector<4x16x16xf32> to vector<4x16xf32>
    %122 = vector.shape_cast %121 : vector<4x16xf32> to vector<4x16x1xf32>
    %123 = tpu.reciprocal %122 {approx = true} : vector<4x16x1xf32> -> vector<4x16x1xf32>
    %124 = vector.broadcast %123 : vector<4x16x1xf32> to vector<4x16x16xf32>
    %125 = arith.mulf %120, %124 : vector<4x16x16xf32>
    "tpu.trace_start"() <{level = 10 : i32, message = "gqk,gkd->gqd"}> : () -> ()
    %cst_49 = arith.constant dense<0.000000e+00> : vector<4x16x16xf32>
    %126 = tpu.matmul %125, %113, %cst_49 {dimension_numbers = #tpu.dot_dimension_numbers<[2], [1], [1], [2], [0, 0, 0, 1, 1, 2], [0], [0]>} : vector<4x16x16xf32>, vector<4x16x16xf32>, vector<4x16x16xf32> -> vector<4x16x16xf32>
    "tpu.trace_stop"() : () -> ()
    %127 = vector.extract_strided_slice %126 {offsets = [0, 0, 0], sizes = [2, 16, 16], strides = [1, 1, 1]} : vector<4x16x16xf32> to vector<2x16x16xf32>
    %128 = vector.shape_cast %127 : vector<2x16x16xf32> to vector<32x16xf32>
    %129 = vector.extract_strided_slice %83 {offsets = [0, 0], sizes = [16, 32], strides = [1, 1]} : vector<32x32xf32> to vector<16x32xf32>
    %cst_50 = arith.constant dense<0.000000e+00> : vector<32x32xf32>
    %130 = tpu.matmul %128, %129, %cst_50 {dimension_numbers = #tpu.dot_dimension_numbers<[1], [0], [0], [1], [0, 0, 1, 1], [], []>} : vector<32x16xf32>, vector<16x32xf32>, vector<32x32xf32> -> vector<32x32xf32>
    %131 = vector.broadcast %89 : vector<1x32xf32> to vector<32x32xf32>
    %132 = arith.addf %131, %130 : vector<32x32xf32>
    %133 = vector.extract_strided_slice %126 {offsets = [2, 0, 0], sizes = [2, 16, 16], strides = [1, 1, 1]} : vector<4x16x16xf32> to vector<2x16x16xf32>
    %134 = vector.shape_cast %133 : vector<2x16x16xf32> to vector<32x16xf32>
    %135 = vector.extract_strided_slice %83 {offsets = [16, 0], sizes = [16, 32], strides = [1, 1]} : vector<32x32xf32> to vector<16x32xf32>
    %cst_51 = arith.constant dense<0.000000e+00> : vector<32x32xf32>
    %136 = tpu.matmul %134, %135, %cst_51 {dimension_numbers = #tpu.dot_dimension_numbers<[1], [0], [0], [1], [0, 0, 1, 1], [], []>} : vector<32x16xf32>, vector<16x32xf32>, vector<32x32xf32> -> vector<32x32xf32>
    %137 = arith.addf %132, %136 : vector<32x32xf32>
    %138 = arith.addf %74, %137 : vector<32x32xf32>
    %cst_52 = arith.constant dense<0.000000e+00> : vector<32xf32>
    %139 = vector.multi_reduction <add>, %138, %cst_52 [1] : vector<32x32xf32> to vector<32xf32>
    %140 = vector.shape_cast %139 : vector<32xf32> to vector<32x1xf32>
    %cst_53 = arith.constant 3.200000e+01 : f32
    %141 = vector.broadcast %cst_53 : f32 to vector<32x1xf32>
    %142 = arith.divf %140, %141 : vector<32x1xf32>
    %143 = vector.broadcast %142 : vector<32x1xf32> to vector<32x32xf32>
    %144 = arith.subf %138, %143 : vector<32x32xf32>
    %145 = arith.mulf %144, %144 : vector<32x32xf32>
    %cst_54 = arith.constant dense<0.000000e+00> : vector<32xf32>
    %146 = vector.multi_reduction <add>, %145, %cst_54 [1] : vector<32x32xf32> to vector<32xf32>
    %147 = vector.shape_cast %146 : vector<32xf32> to vector<32x1xf32>
    %cst_55 = arith.constant 3.200000e+01 : f32
    %148 = vector.broadcast %cst_55 : f32 to vector<32x1xf32>
    %149 = arith.divf %147, %148 : vector<32x1xf32>
    %150 = vector.broadcast %142 : vector<32x1xf32> to vector<32x32xf32>
    %151 = arith.subf %138, %150 : vector<32x32xf32>
    %cst_56 = arith.constant 9.99999974E-6 : f32
    %152 = vector.broadcast %cst_56 : f32 to vector<32x1xf32>
    %153 = arith.addf %149, %152 : vector<32x1xf32>
    %154 = math.rsqrt %153 : vector<32x1xf32>
    %155 = vector.broadcast %154 : vector<32x1xf32> to vector<32x32xf32>
    %156 = arith.mulf %151, %155 : vector<32x32xf32>
    %157 = vector.broadcast %90 : vector<1x32xf32> to vector<32x32xf32>
    %158 = arith.mulf %156, %157 : vector<32x32xf32>
    %159 = vector.broadcast %91 : vector<1x32xf32> to vector<32x32xf32>
    %160 = arith.addf %158, %159 : vector<32x32xf32>
    %cst_57 = arith.constant dense<0.000000e+00> : vector<32x64xf32>
    %161 = tpu.matmul %160, %85, %cst_57 {dimension_numbers = #tpu.dot_dimension_numbers<[1], [0], [0], [1], [0, 0, 1, 1], [], []>} : vector<32x32xf32>, vector<32x64xf32>, vector<32x64xf32> -> vector<32x64xf32>
    %162 = vector.broadcast %92 : vector<1x64xf32> to vector<32x64xf32>
    %163 = arith.addf %161, %162 : vector<32x64xf32>
    %cst_58 = arith.constant 5.000000e-01 : f32
    %164 = vector.broadcast %cst_58 : f32 to vector<32x64xf32>
    %165 = arith.mulf %164, %163 : vector<32x64xf32>
    %cst_59 = arith.constant 4.471500e-02 : f32
    %166 = vector.broadcast %cst_59 : f32 to vector<32x64xf32>
    %167 = arith.mulf %166, %163 : vector<32x64xf32>
    %168 = arith.mulf %167, %163 : vector<32x64xf32>
    %169 = arith.mulf %168, %163 : vector<32x64xf32>
    %170 = arith.addf %163, %169 : vector<32x64xf32>
    %cst_60 = arith.constant 0.797884583 : f32
    %171 = vector.broadcast %cst_60 : f32 to vector<32x64xf32>
    %172 = arith.mulf %171, %170 : vector<32x64xf32>
    %173 = math.tanh %172 : vector<32x64xf32>
    %cst_61 = arith.constant 1.000000e+00 : f32
    %174 = vector.broadcast %cst_61 : f32 to vector<32x64xf32>
    %175 = arith.addf %174, %173 : vector<32x64xf32>
    %176 = arith.mulf %165, %175 : vector<32x64xf32>
    %cst_62 = arith.constant dense<0.000000e+00> : vector<32x32xf32>
    %177 = tpu.matmul %176, %87, %cst_62 {dimension_numbers = #tpu.dot_dimension_numbers<[1], [0], [0], [1], [0, 0, 1, 1], [], []>} : vector<32x64xf32>, vector<64x32xf32>, vector<32x32xf32> -> vector<32x32xf32>
    %178 = vector.broadcast %93 : vector<1x32xf32> to vector<32x32xf32>
    %179 = arith.addf %177, %178 : vector<32x32xf32>
    %180 = arith.addf %160, %179 : vector<32x32xf32>
    %cst_63 = arith.constant dense<0.000000e+00> : vector<32xf32>
    %181 = vector.multi_reduction <add>, %180, %cst_63 [1] : vector<32x32xf32> to vector<32xf32>
    %182 = vector.shape_cast %181 : vector<32xf32> to vector<32x1xf32>
    %cst_64 = arith.constant 3.200000e+01 : f32
    %183 = vector.broadcast %cst_64 : f32 to vector<32x1xf32>
    %184 = arith.divf %182, %183 : vector<32x1xf32>
    %185 = vector.broadcast %184 : vector<32x1xf32> to vector<32x32xf32>
    %186 = arith.subf %180, %185 : vector<32x32xf32>
    %187 = arith.mulf %186, %186 : vector<32x32xf32>
    %cst_65 = arith.constant dense<0.000000e+00> : vector<32xf32>
    %188 = vector.multi_reduction <add>, %187, %cst_65 [1] : vector<32x32xf32> to vector<32xf32>
    %189 = vector.shape_cast %188 : vector<32xf32> to vector<32x1xf32>
    %cst_66 = arith.constant 3.200000e+01 : f32
    %190 = vector.broadcast %cst_66 : f32 to vector<32x1xf32>
    %191 = arith.divf %189, %190 : vector<32x1xf32>
    %192 = vector.broadcast %184 : vector<32x1xf32> to vector<32x32xf32>
    %193 = arith.subf %180, %192 : vector<32x32xf32>
    %cst_67 = arith.constant 9.99999974E-6 : f32
    %194 = vector.broadcast %cst_67 : f32 to vector<32x1xf32>
    %195 = arith.addf %191, %194 : vector<32x1xf32>
    %196 = math.rsqrt %195 : vector<32x1xf32>
    %197 = vector.broadcast %196 : vector<32x1xf32> to vector<32x32xf32>
    %198 = arith.mulf %193, %197 : vector<32x32xf32>
    %199 = vector.broadcast %94 : vector<1x32xf32> to vector<32x32xf32>
    %200 = arith.mulf %198, %199 : vector<32x32xf32>
    %201 = vector.broadcast %95 : vector<1x32xf32> to vector<32x32xf32>
    %202 = arith.addf %200, %201 : vector<32x32xf32>
    %c1_68 = arith.constant 1 : index
    %c0_69 = arith.constant 0 : index
    %c0_70 = arith.constant 0 : index
    %203 = vector.load %arg3[%c1_68, %c0_69, %c0_70] : memref<2x160x128xf32, #tpu.memory_space<vmem>>, vector<1x32x128xf32>
    %204 = vector.shape_cast %203 : vector<1x32x128xf32> to vector<32x128xf32>
    %c1_71 = arith.constant 1 : index
    %c32_72 = arith.constant 32 : index
    %c0_73 = arith.constant 0 : index
    %205 = vector.load %arg3[%c1_71, %c32_72, %c0_73] : memref<2x160x128xf32, #tpu.memory_space<vmem>>, vector<1x32x32xf32>
    %206 = vector.shape_cast %205 : vector<1x32x32xf32> to vector<32x32xf32>
    %c1_74 = arith.constant 1 : index
    %c64_75 = arith.constant 64 : index
    %c0_76 = arith.constant 0 : index
    %207 = vector.load %arg3[%c1_74, %c64_75, %c0_76] : memref<2x160x128xf32, #tpu.memory_space<vmem>>, vector<1x32x64xf32>
    %208 = vector.shape_cast %207 : vector<1x32x64xf32> to vector<32x64xf32>
    %c1_77 = arith.constant 1 : index
    %c96_78 = arith.constant 96 : index
    %c0_79 = arith.constant 0 : index
    %209 = vector.load %arg3[%c1_77, %c96_78, %c0_79] : memref<2x160x128xf32, #tpu.memory_space<vmem>>, vector<1x64x32xf32>
    %210 = vector.shape_cast %209 : vector<1x64x32xf32> to vector<64x32xf32>
    %c16 = arith.constant 16 : index
    %c0_80 = arith.constant 0 : index
    %211 = vector.load %arg5[%c16, %c0_80] : memref<24x128xf32, #tpu.memory_space<vmem>>, vector<1x128xf32>
    %c17 = arith.constant 17 : index
    %c0_81 = arith.constant 0 : index
    %212 = vector.load %arg5[%c17, %c0_81] : memref<24x128xf32, #tpu.memory_space<vmem>>, vector<1x32xf32>
    %c18 = arith.constant 18 : index
    %c0_82 = arith.constant 0 : index
    %213 = vector.load %arg5[%c18, %c0_82] : memref<24x128xf32, #tpu.memory_space<vmem>>, vector<1x32xf32>
    %c19 = arith.constant 19 : index
    %c0_83 = arith.constant 0 : index
    %214 = vector.load %arg5[%c19, %c0_83] : memref<24x128xf32, #tpu.memory_space<vmem>>, vector<1x32xf32>
    %c20 = arith.constant 20 : index
    %c0_84 = arith.constant 0 : index
    %215 = vector.load %arg5[%c20, %c0_84] : memref<24x128xf32, #tpu.memory_space<vmem>>, vector<1x64xf32>
    %c21 = arith.constant 21 : index
    %c0_85 = arith.constant 0 : index
    %216 = vector.load %arg5[%c21, %c0_85] : memref<24x128xf32, #tpu.memory_space<vmem>>, vector<1x32xf32>
    %c22 = arith.constant 22 : index
    %c0_86 = arith.constant 0 : index
    %217 = vector.load %arg5[%c22, %c0_86] : memref<24x128xf32, #tpu.memory_space<vmem>>, vector<1x32xf32>
    %c23 = arith.constant 23 : index
    %c0_87 = arith.constant 0 : index
    %218 = vector.load %arg5[%c23, %c0_87] : memref<24x128xf32, #tpu.memory_space<vmem>>, vector<1x32xf32>
    %cst_88 = arith.constant dense<0.000000e+00> : vector<32x128xf32>
    %219 = tpu.matmul %202, %204, %cst_88 {dimension_numbers = #tpu.dot_dimension_numbers<[1], [0], [0], [1], [0, 0, 1, 1], [], []>} : vector<32x32xf32>, vector<32x128xf32>, vector<32x128xf32> -> vector<32x128xf32>
    %220 = vector.broadcast %211 : vector<1x128xf32> to vector<32x128xf32>
    %221 = arith.addf %219, %220 : vector<32x128xf32>
    %222 = vector.extract_strided_slice %221 {offsets = [0, 0], sizes = [32, 16], strides = [1, 1]} : vector<32x128xf32> to vector<32x16xf32>
    %223 = vector.shape_cast %222 : vector<32x16xf32> to vector<2x16x16xf32>
    %224 = vector.extract_strided_slice %221 {offsets = [0, 16], sizes = [32, 16], strides = [1, 1]} : vector<32x128xf32> to vector<32x16xf32>
    %225 = vector.shape_cast %224 : vector<32x16xf32> to vector<2x16x16xf32>
    %226 = tpu.concatenate %223, %225 in 0 : vector<2x16x16xf32>, vector<2x16x16xf32> -> vector<4x16x16xf32>
    %227 = vector.extract_strided_slice %221 {offsets = [0, 32], sizes = [32, 16], strides = [1, 1]} : vector<32x128xf32> to vector<32x16xf32>
    %228 = vector.shape_cast %227 : vector<32x16xf32> to vector<2x16x16xf32>
    %229 = vector.extract_strided_slice %221 {offsets = [0, 48], sizes = [32, 16], strides = [1, 1]} : vector<32x128xf32> to vector<32x16xf32>
    %230 = vector.shape_cast %229 : vector<32x16xf32> to vector<2x16x16xf32>
    %231 = tpu.concatenate %228, %230 in 0 : vector<2x16x16xf32>, vector<2x16x16xf32> -> vector<4x16x16xf32>
    %232 = vector.extract_strided_slice %221 {offsets = [0, 64], sizes = [32, 16], strides = [1, 1]} : vector<32x128xf32> to vector<32x16xf32>
    %233 = vector.shape_cast %232 : vector<32x16xf32> to vector<2x16x16xf32>
    %234 = vector.extract_strided_slice %221 {offsets = [0, 80], sizes = [32, 16], strides = [1, 1]} : vector<32x128xf32> to vector<32x16xf32>
    %235 = vector.shape_cast %234 : vector<32x16xf32> to vector<2x16x16xf32>
    %236 = tpu.concatenate %233, %235 in 0 : vector<2x16x16xf32>, vector<2x16x16xf32> -> vector<4x16x16xf32>
    "tpu.trace_start"() <{level = 10 : i32, message = "gqd,gkd->gqk"}> : () -> ()
    %cst_89 = arith.constant dense<0.000000e+00> : vector<4x16x16xf32>
    %237 = tpu.matmul %226, %231, %cst_89 {dimension_numbers = #tpu.dot_dimension_numbers<[2], [2], [1], [1], [0, 0, 0, 1, 1, 1], [0], [0]>} : vector<4x16x16xf32>, vector<4x16x16xf32>, vector<4x16x16xf32> -> vector<4x16x16xf32>
    "tpu.trace_stop"() : () -> ()
    %238 = arith.addf %237, %79 : vector<4x16x16xf32>
    %cst_90 = arith.constant dense<0xFF800000> : vector<4x16xf32>
    %239 = vector.multi_reduction <maximumf>, %238, %cst_90 [2] : vector<4x16x16xf32> to vector<4x16xf32>
    %240 = vector.shape_cast %239 : vector<4x16xf32> to vector<4x16x1xf32>
    %241 = vector.broadcast %240 : vector<4x16x1xf32> to vector<4x16x16xf32>
    %242 = arith.subf %238, %241 : vector<4x16x16xf32>
    %243 = math.exp %242 : vector<4x16x16xf32>
    %cst_91 = arith.constant dense<0.000000e+00> : vector<4x16xf32>
    %244 = vector.multi_reduction <add>, %243, %cst_91 [2] : vector<4x16x16xf32> to vector<4x16xf32>
    %245 = vector.shape_cast %244 : vector<4x16xf32> to vector<4x16x1xf32>
    %246 = tpu.reciprocal %245 {approx = true} : vector<4x16x1xf32> -> vector<4x16x1xf32>
    %247 = vector.broadcast %246 : vector<4x16x1xf32> to vector<4x16x16xf32>
    %248 = arith.mulf %243, %247 : vector<4x16x16xf32>
    "tpu.trace_start"() <{level = 10 : i32, message = "gqk,gkd->gqd"}> : () -> ()
    %cst_92 = arith.constant dense<0.000000e+00> : vector<4x16x16xf32>
    %249 = tpu.matmul %248, %236, %cst_92 {dimension_numbers = #tpu.dot_dimension_numbers<[2], [1], [1], [2], [0, 0, 0, 1, 1, 2], [0], [0]>} : vector<4x16x16xf32>, vector<4x16x16xf32>, vector<4x16x16xf32> -> vector<4x16x16xf32>
    "tpu.trace_stop"() : () -> ()
    %250 = vector.extract_strided_slice %249 {offsets = [0, 0, 0], sizes = [2, 16, 16], strides = [1, 1, 1]} : vector<4x16x16xf32> to vector<2x16x16xf32>
    %251 = vector.shape_cast %250 : vector<2x16x16xf32> to vector<32x16xf32>
    %252 = vector.extract_strided_slice %206 {offsets = [0, 0], sizes = [16, 32], strides = [1, 1]} : vector<32x32xf32> to vector<16x32xf32>
    %cst_93 = arith.constant dense<0.000000e+00> : vector<32x32xf32>
    %253 = tpu.matmul %251, %252, %cst_93 {dimension_numbers = #tpu.dot_dimension_numbers<[1], [0], [0], [1], [0, 0, 1, 1], [], []>} : vector<32x16xf32>, vector<16x32xf32>, vector<32x32xf32> -> vector<32x32xf32>
    %254 = vector.broadcast %212 : vector<1x32xf32> to vector<32x32xf32>
    %255 = arith.addf %254, %253 : vector<32x32xf32>
    %256 = vector.extract_strided_slice %249 {offsets = [2, 0, 0], sizes = [2, 16, 16], strides = [1, 1, 1]} : vector<4x16x16xf32> to vector<2x16x16xf32>
    %257 = vector.shape_cast %256 : vector<2x16x16xf32> to vector<32x16xf32>
    %258 = vector.extract_strided_slice %206 {offsets = [16, 0], sizes = [16, 32], strides = [1, 1]} : vector<32x32xf32> to vector<16x32xf32>
    %cst_94 = arith.constant dense<0.000000e+00> : vector<32x32xf32>
    %259 = tpu.matmul %257, %258, %cst_94 {dimension_numbers = #tpu.dot_dimension_numbers<[1], [0], [0], [1], [0, 0, 1, 1], [], []>} : vector<32x16xf32>, vector<16x32xf32>, vector<32x32xf32> -> vector<32x32xf32>
    %260 = arith.addf %255, %259 : vector<32x32xf32>
    %261 = arith.addf %202, %260 : vector<32x32xf32>
    %cst_95 = arith.constant dense<0.000000e+00> : vector<32xf32>
    %262 = vector.multi_reduction <add>, %261, %cst_95 [1] : vector<32x32xf32> to vector<32xf32>
    %263 = vector.shape_cast %262 : vector<32xf32> to vector<32x1xf32>
    %cst_96 = arith.constant 3.200000e+01 : f32
    %264 = vector.broadcast %cst_96 : f32 to vector<32x1xf32>
    %265 = arith.divf %263, %264 : vector<32x1xf32>
    %266 = vector.broadcast %265 : vector<32x1xf32> to vector<32x32xf32>
    %267 = arith.subf %261, %266 : vector<32x32xf32>
    %268 = arith.mulf %267, %267 : vector<32x32xf32>
    %cst_97 = arith.constant dense<0.000000e+00> : vector<32xf32>
    %269 = vector.multi_reduction <add>, %268, %cst_97 [1] : vector<32x32xf32> to vector<32xf32>
    %270 = vector.shape_cast %269 : vector<32xf32> to vector<32x1xf32>
    %cst_98 = arith.constant 3.200000e+01 : f32
    %271 = vector.broadcast %cst_98 : f32 to vector<32x1xf32>
    %272 = arith.divf %270, %271 : vector<32x1xf32>
    %273 = vector.broadcast %265 : vector<32x1xf32> to vector<32x32xf32>
    %274 = arith.subf %261, %273 : vector<32x32xf32>
    %cst_99 = arith.constant 9.99999974E-6 : f32
    %275 = vector.broadcast %cst_99 : f32 to vector<32x1xf32>
    %276 = arith.addf %272, %275 : vector<32x1xf32>
    %277 = math.rsqrt %276 : vector<32x1xf32>
    %278 = vector.broadcast %277 : vector<32x1xf32> to vector<32x32xf32>
    %279 = arith.mulf %274, %278 : vector<32x32xf32>
    %280 = vector.broadcast %213 : vector<1x32xf32> to vector<32x32xf32>
    %281 = arith.mulf %279, %280 : vector<32x32xf32>
    %282 = vector.broadcast %214 : vector<1x32xf32> to vector<32x32xf32>
    %283 = arith.addf %281, %282 : vector<32x32xf32>
    %cst_100 = arith.constant dense<0.000000e+00> : vector<32x64xf32>
    %284 = tpu.matmul %283, %208, %cst_100 {dimension_numbers = #tpu.dot_dimension_numbers<[1], [0], [0], [1], [0, 0, 1, 1], [], []>} : vector<32x32xf32>, vector<32x64xf32>, vector<32x64xf32> -> vector<32x64xf32>
    %285 = vector.broadcast %215 : vector<1x64xf32> to vector<32x64xf32>
    %286 = arith.addf %284, %285 : vector<32x64xf32>
    %cst_101 = arith.constant 5.000000e-01 : f32
    %287 = vector.broadcast %cst_101 : f32 to vector<32x64xf32>
    %288 = arith.mulf %287, %286 : vector<32x64xf32>
    %cst_102 = arith.constant 4.471500e-02 : f32
    %289 = vector.broadcast %cst_102 : f32 to vector<32x64xf32>
    %290 = arith.mulf %289, %286 : vector<32x64xf32>
    %291 = arith.mulf %290, %286 : vector<32x64xf32>
    %292 = arith.mulf %291, %286 : vector<32x64xf32>
    %293 = arith.addf %286, %292 : vector<32x64xf32>
    %cst_103 = arith.constant 0.797884583 : f32
    %294 = vector.broadcast %cst_103 : f32 to vector<32x64xf32>
    %295 = arith.mulf %294, %293 : vector<32x64xf32>
    %296 = math.tanh %295 : vector<32x64xf32>
    %cst_104 = arith.constant 1.000000e+00 : f32
    %297 = vector.broadcast %cst_104 : f32 to vector<32x64xf32>
    %298 = arith.addf %297, %296 : vector<32x64xf32>
    %299 = arith.mulf %288, %298 : vector<32x64xf32>
    %cst_105 = arith.constant dense<0.000000e+00> : vector<32x32xf32>
    %300 = tpu.matmul %299, %210, %cst_105 {dimension_numbers = #tpu.dot_dimension_numbers<[1], [0], [0], [1], [0, 0, 1, 1], [], []>} : vector<32x64xf32>, vector<64x32xf32>, vector<32x32xf32> -> vector<32x32xf32>
    %301 = vector.broadcast %216 : vector<1x32xf32> to vector<32x32xf32>
    %302 = arith.addf %300, %301 : vector<32x32xf32>
    %303 = arith.addf %283, %302 : vector<32x32xf32>
    %cst_106 = arith.constant dense<0.000000e+00> : vector<32xf32>
    %304 = vector.multi_reduction <add>, %303, %cst_106 [1] : vector<32x32xf32> to vector<32xf32>
    %305 = vector.shape_cast %304 : vector<32xf32> to vector<32x1xf32>
    %cst_107 = arith.constant 3.200000e+01 : f32
    %306 = vector.broadcast %cst_107 : f32 to vector<32x1xf32>
    %307 = arith.divf %305, %306 : vector<32x1xf32>
    %308 = vector.broadcast %307 : vector<32x1xf32> to vector<32x32xf32>
    %309 = arith.subf %303, %308 : vector<32x32xf32>
    %310 = arith.mulf %309, %309 : vector<32x32xf32>
    %cst_108 = arith.constant dense<0.000000e+00> : vector<32xf32>
    %311 = vector.multi_reduction <add>, %310, %cst_108 [1] : vector<32x32xf32> to vector<32xf32>
    %312 = vector.shape_cast %311 : vector<32xf32> to vector<32x1xf32>
    %cst_109 = arith.constant 3.200000e+01 : f32
    %313 = vector.broadcast %cst_109 : f32 to vector<32x1xf32>
    %314 = arith.divf %312, %313 : vector<32x1xf32>
    %315 = vector.broadcast %307 : vector<32x1xf32> to vector<32x32xf32>
    %316 = arith.subf %303, %315 : vector<32x32xf32>
    %cst_110 = arith.constant 9.99999974E-6 : f32
    %317 = vector.broadcast %cst_110 : f32 to vector<32x1xf32>
    %318 = arith.addf %314, %317 : vector<32x1xf32>
    %319 = math.rsqrt %318 : vector<32x1xf32>
    %320 = vector.broadcast %319 : vector<32x1xf32> to vector<32x32xf32>
    %321 = arith.mulf %316, %320 : vector<32x32xf32>
    %322 = vector.broadcast %217 : vector<1x32xf32> to vector<32x32xf32>
    %323 = arith.mulf %321, %322 : vector<32x32xf32>
    %324 = vector.broadcast %218 : vector<1x32xf32> to vector<32x32xf32>
    %325 = arith.addf %323, %324 : vector<32x32xf32>
    %326 = vector.shape_cast %325 : vector<32x32xf32> to vector<2x16x32xf32>
    %327 = vector.extract_strided_slice %326 {offsets = [0, 0, 0], sizes = [2, 1, 32], strides = [1, 1, 1]} : vector<2x16x32xf32> to vector<2x1x32xf32>
    %328 = vector.shape_cast %327 : vector<2x1x32xf32> to vector<2x32xf32>
    %c96_111 = arith.constant 96 : index
    %c0_112 = arith.constant 0 : index
    %329 = vector.load %arg4[%c96_111, %c0_112] : memref<128x128xf32, #tpu.memory_space<vmem>>, vector<32x32xf32>
    %cst_113 = arith.constant dense<0.000000e+00> : vector<2x32xf32>
    %330 = tpu.matmul %328, %329, %cst_113 {dimension_numbers = #tpu.dot_dimension_numbers<[1], [0], [0], [1], [0, 0, 1, 1], [], []>} : vector<2x32xf32>, vector<32x32xf32>, vector<2x32xf32> -> vector<2x32xf32>
    %c3 = arith.constant 3 : index
    %c0_114 = arith.constant 0 : index
    %331 = vector.load %arg5[%c3, %c0_114] : memref<24x128xf32, #tpu.memory_space<vmem>>, vector<1x32xf32>
    %332 = vector.broadcast %331 : vector<1x32xf32> to vector<2x32xf32>
    %333 = arith.addf %330, %332 : vector<2x32xf32>
    %334 = math.tanh %333 : vector<2x32xf32>
    %c4 = arith.constant 4 : index
    %c0_115 = arith.constant 0 : index
    %335 = vector.load %arg5[%c4, %c0_115] : memref<24x128xf32, #tpu.memory_space<vmem>>, vector<1x32xf32>
    %336 = vector.broadcast %335 : vector<1x32xf32> to vector<2x32xf32>
    %337 = arith.mulf %334, %336 : vector<2x32xf32>
    %cst_116 = arith.constant dense<0.000000e+00> : vector<2xf32>
    %338 = vector.multi_reduction <add>, %337, %cst_116 [1] : vector<2x32xf32> to vector<2xf32>
    %339 = vector.shape_cast %338 : vector<2xf32> to vector<2x1xf32>
    %c5 = arith.constant 5 : index
    %c0_117 = arith.constant 0 : index
    %340 = vector.load %arg5[%c5, %c0_117] : memref<24x128xf32, #tpu.memory_space<vmem>>, vector<1x1xf32>
    %341 = vector.broadcast %340 : vector<1x1xf32> to vector<2x1xf32>
    %342 = arith.addf %339, %341 : vector<2x1xf32>
    %c0_118 = arith.constant 0 : index
    %c0_119 = arith.constant 0 : index
    %343 = vector.load %arg6[%c0_118, %c0_119] : memref<2x1xf32, #tpu.memory_space<vmem>>, vector<2x1xf32>
    tpu.vector_store %arg6[%c0_118, %c0_119], %342 {strides = array<i32>} : memref<2x1xf32, #tpu.memory_space<vmem>>, vector<2x1xf32>,
    return
  }
}

</mosaic_0001>

<bundles_post_ra>
// kernel: model_forward.1
= control target key start
LH: loop header
LB: loop body
LE: loop exit
PB: predicated region body
PF: predicated region fallthrough
CT: control target
= control target key end

     0   :  { %11 = vsyncpa [#allocation3], 0  ;;  %s5263_s0 = inlined_call_operand.vmem [shape: s32[32,2], index: 0, kind: input, shape index: {}]   ;;  %s5264_s1 = inlined_call_operand.vmem [shape: s32[2,16], index: 1, kind: input, shape index: {}]   ;;  %s5265_s2 = inlined_call_operand.vmem [shape: f32[2,16,16], index: 2, kind: input, shape index: {}]   ;;  %s5266_s3 = inlined_call_operand.hbm [shape: f32[2,160,128], index: 3, kind: input, shape index: {}]   ;;  %s5267_s4 = inlined_call_operand.hbm [shape: f32[128,128], index: 4, kind: input, shape index: {}]   ;;  %s5268_s5 = inlined_call_operand.hbm [shape: f32[24,128], index: 5, kind: input, shape index: {}]   ;;  %s5269_s6 = inlined_call_operand.vmem [shape: f32[2,1], index: 6, kind: output, shape index: {}]  }
   0x1   :  { %12 = vsyncpa [#allocation5], 0  ;;  %s4665_s21 = smov [#allocation4]   ;;  %s4666_s23 = smov [#allocation2]  }
   0x2   :  { %s36_s22 = sshll.u32 %s4665_s21, 4  ;;  %s24_s24 = sshll.u32 %s4666_s23, 4  ;;  %s37_s22 = int_to_ptr.vmem [resolvable:$true] %s36_s22  ;;  %s25_s24 = int_to_ptr.vmem [resolvable:$true] %s24_s24 }
   0x3   :  { %s4609_s25 = scalar_lea.vmem %s37_s22, 2048  ;;  %p4614_p1 = scmp.lt.s32.totalorder %s37_s22, %s37_s22 }
   0x4   :  { %p4610_p0 = scmp.ne.s32.totalorder %s37_s22, %s4609_s25  ;;  %p4615_p2 = scmp.lt.s32.totalorder %s4609_s25, %s4609_s25 }
   0x6   :  { %p4616_p3 = por %p4615_p2, %p4614_p1 }
   0x8   :  { %p4617_p4 = pnand %p4616_p3, %p4610_p0 }
   0xa   :  { %4620 = shalt.err (!%p4617_p4)
}
   0xb   :  { %s4667_s26 = smov 128   ;;  %s4668_s27 = smov 8  }
   0xc   :  { %42 = dma.hbm_to_vmem [thread:$0]  %s5267_s4, 2048, %s37_s22, [#allocation5], %s4667_s26, %s4667_s26, %s4668_s27  }
   0xd   :  { %s4629_s30 = scalar_lea.vmem %s25_s24, 5120  ;;  %p4634_p6 = scmp.lt.s32.totalorder %s25_s24, %s25_s24 }
   0xe   :  { %p4630_p5 = scmp.ne.s32.totalorder %s25_s24, %s4629_s30  ;;  %p4635_p7 = scmp.lt.s32.totalorder %s4629_s30, %s4629_s30 }
  0x10   :  { %p4636_p8 = por %p4635_p7, %p4634_p6 }
  0x12   :  { %p4637_p9 = pnand %p4636_p8, %p4630_p5 }
  0x14   :  { %4640 = shalt.err (!%p4637_p9)
}
  0x15   :  { %30 = dma.hbm_to_vmem [thread:$0]  %s5266_s3, 5120, %s25_s24, [#allocation3], %s4667_s26, %s4667_s26, %s4668_s27  }
  0x16   :  { %s4669_s9 = smov [#allocation6]  }
  0x17   :  { %s48_s10 = sshll.u32 %s4669_s9, 4  ;;  %s49_s10 = int_to_ptr.vmem [resolvable:$true] %s48_s10 }
  0x18   :  { %s4649_s11 = scalar_lea.vmem %s49_s10, 384  ;;  %p4654_p11 = scmp.lt.s32.totalorder %s49_s10, %s49_s10 }
  0x19   :  { %p4650_p10 = scmp.ne.s32.totalorder %s49_s10, %s4649_s11  ;;  %p4655_p12 = scmp.lt.s32.totalorder %s4649_s11, %s4649_s11 }
  0x1b   :  { %p4656_p13 = por %p4655_p12, %p4654_p11 }
  0x1d   :  { %p4657_p0 = pnand %p4656_p13, %p4650_p10 }
  0x1f   :  { %4660 = shalt.err (!%p4657_p0)
}
  0x20   :  { %54 = dma.hbm_to_vmem [thread:$0]  %s5268_s5, 384, %s49_s10, [#allocation5], %s4667_s26, %s4667_s26, %s4668_s27  }
  0x21   :  { %4661 = dma.done.wait [#allocation3], 5120  }
  0x22   :  { %4662 = vsyncadd [#allocation3], 4294962176 }
  0x23   :  { %4663 = dma.done.wait [#allocation5], 2432  }
  0x24   :  { %4664 = vsyncadd [#allocation5], 4294964864  ;;  %v4670_v0 = vmov 0   ;;  %v4725_v1 = vld [vmem:[%s5263_s0] sm:$0xff]  ;;  %v4730_v2 = vld [vmem:[%s5263_s0 + $0x10] sm:$0xff]  ;;  %v85_v12 = vlaneseq  ;;  %v4672_v13 = vmov 1  }
  0x25   :  { %4461 = vset.pattern.permute.xlu0 %v4670_v0  ;;  %4462 = vset.pattern.permute.xlu1 %v4670_v0  ;;  %v80_v3 = vld [vmem:[#allocation4 + $0x38] sm:$0xff]  ;;  %v79_v4 = vld [vmem:[#allocation4 + $0x30] sm:$0xff]  ;;  %v4737_v5 = vld [vmem:[%s5263_s0 + $0x8] sm:$0xff]  ;;  %v4671_v9 = vmov 1966171168   ;;  %vm333_vm1 = vcmp.eq.s32.totalorder %v4730_v2, 0 }
  0x26   :  { %88 = vperm.xlu0 %4461, %v4725_v1   ;;  %94 = vperm.xlu1 %4462, %v4730_v2   ;;  %v4742_v6 = vld [vmem:[%s5263_s0 + $0x18] sm:$0xff]  ;;  %v78_v7 = vld [vmem:[#allocation4 + $0x28] sm:$0xff]  ;;  %v77_v8 = vld [vmem:[#allocation4 + $0x20] sm:$0xff]  ;;  %v348_v10 = vunpack.c.l.s4 %v4671_v9  ;;  %v351_v17 = vshrl.u32 %v85_v12, 7  ;;  %v4673_v19 = vmov 0.0   ;;  %vm383_vm3 = vcmask 130048  }
  0x27   :  { %4135 = vmatprep.subr.mxu0 %v80_v3  ;;  %v76_v11 = vld [vmem:[#allocation4 + $0x18] sm:$0xff]  ;;  %vm334_vm0 = vcmp.eq.s32.totalorder %v4742_v6, 0  ;;  %v75_v14 = vld [vmem:[#allocation4 + $0x10] sm:$0xff]  ;;  %v68_v15 = vld [vmem:[%s5264_s1] sm:$0x3]  ;;  %v3840_v21 = vsel %vm333_vm1, 1.0, %v4673_v19 }
  0x28   :  { %4136 = vmatpush3.msra.mxu0 %v80_v3  ;;  %v349_v16 = vunpack.c.0.s8 %v348_v10  ;;  %v74_v18 = vld [vmem:[#allocation4 + $0x8] sm:$0xff]  ;;  %v4755_v20 = vsel %vm334_vm0, 1.0, %v4673_v19  ;;  %vm343_vm2 = vcmp.ge.s32.totalorder %v68_v15, 2  ;;  %v73_v22 = vld [vmem:[#allocation4] sm:$0xff]  ;;  %v371_v29 = vsub.s32 0, %v351_v17  ;;  %v4771_v35 = vld [vmem:[%s5265_s2 + $0x10] sm:$0xff] }
  0x29   :  { %4137 = vmatprep.subr.mxu0 %v79_v4  ;;  %v4470_v23 = vpack.i.bf16 %v4755_v20, %v3840_v21  ;;  %v3842_v25 = vsel %vm343_vm2, 1.0, %v4673_v19  ;;  %v4763_v31 = vld [vmem:[%s5265_s2] sm:$0xff]  ;;  %v4776_v36 = vld [vmem:[%s5265_s2 + $0x8] sm:$0xff]  ;;  %v4789_v40 = vld [vmem:[%s5265_s2 + $0x18] sm:$0xff]  ;;  %vm331_vm4 = vcmp.eq.s32.totalorder %v4725_v1, 0  ;;  %vm332_vm5 = vcmp.eq.s32.totalorder %v4737_v5, 0 }
  0x2a   :  { %91 = vperm.xlu0 %4461, %v4737_v5   ;;  %97 = vperm.xlu1 %4462, %v4742_v6   ;;  %v352_v24 = vsub.s32 %v349_v16, %v351_v17  ;;  %v3838_v45 = vsel %vm331_vm4, 1.0, %v4673_v19  ;;  %v3839_v47 = vsel %vm332_vm5, 1.0, %v4673_v19  ;;  %v84_v50 = vld [vmem:[#allocation4 + $0x58] sm:$0xff]  ;;  %v83_v51 = vld [vmem:[#allocation4 + $0x50] sm:$0xff]  ;;  %v572_v52 = vsub.f32 1.0, %v3840_v21  ;;  %v82_v53 = vld [vmem:[#allocation4 + $0x48] sm:$0xff] }
  0x2b   :  { %4138 = vmatpush3.msra.mxu0 %v79_v4  ;;  %v570_v46 = vsub.f32 1.0, %v3838_v45  ;;  %v4465_v48 = vpack.i.bf16 %v3839_v47, %v3838_v45  ;;  %v571_v49 = vsub.f32 1.0, %v3839_v47  ;;  %4157 = vmatprep.subr.mxu1 %v84_v50  ;;  %v81_v54 = vld [vmem:[#allocation4 + $0x40] sm:$0xff]  ;;  %v573_v55 = vsub.f32 1.0, %v4755_v20  ;;  %s4674_s2 = smov 112   ;;  %s4675_s27 = smov 96  }
  0x2c   :  { %4139 = vmatprep.subr.mxu0 %v78_v7  ;;  %v353_v26 = vrot.slane %v3842_v25, %v352_v24  ;;  %4158 = vmatpush3.msra.mxu1 %v84_v50  ;;  %v86_v56 = vand.u32 127, %v85_v12  ;;  %vm135_vm6 = vcmask 523264   ;;  %vm233_vm11 = vcmask 261120   ;;  %s4676_s28 = smov 64  }
  0x2d   :  { %4140 = vmatpush3.msra.mxu0 %v78_v7  ;;  %4159 = vmatprep.subr.mxu1 %v83_v51  ;;  %vm4677_vm0 = vmmov 0   ;;  %vm3723_vm1 = vcmask 1041409   ;;  %vm3804_vm2 = vcmask 254976  }
  0x2e   :  { %4141 = vmatprep.subr.mxu0 %v77_v8  ;;  %4463 = vset.pattern.permute.xlu1 %v4672_v13  ;;  %v354_v27 = vcombine.high %v353_v26, %v353_v26  ;;  %v361_v28 = vrot.slane %v353_v26, %v352_v24 }
  0x2f   :  { %4142 = vmatpush3.msra.mxu0 %v77_v8  ;;  %4464 = vset.pattern.permute.xlu0 %v4672_v13 }
  0x30   :  { %4143 = vmatprep.subr.mxu0 %v76_v11  ;;  %v368_v30 = vrot.slane %v354_v27, %v352_v24  ;;  %v372_v32 = vrot.slane %v361_v28, %v371_v29  ;;  %4160 = vmatpush3.msra.mxu1 %v83_v51 }
  0x31   :  { %4144 = vmatpush3.msra.mxu0 %v76_v11  ;;  %4161 = vmatprep.subr.mxu1 %v82_v53 }
  0x32   :  { %4145 = vmatprep.subr.mxu0 %v75_v14  ;;  %v4766_v33 = vmul.f32 %v372_v32, %v4763_v31  ;;  %v376_v34 = vrot.slane %v368_v30, %v371_v29  ;;  %v4784_v39 = vmul.f32 %v372_v32, %v4776_v36  ;;  %4162 = vmatpush3.msra.mxu1 %v82_v53 }
  0x33   :  { %4146 = vmatpush3.msra.mxu0 %v75_v14  ;;  %4163 = vmatprep.subr.mxu1 %v81_v54 }
  0x34   :  { %4147 = vmatprep.subr.mxu0 %v74_v18  ;;  %v384_v37 = vsel %vm383_vm3, %v4766_v33, 0.0  ;;  %v4781_v38 = vmul.f32 %v376_v34, %v4771_v35  ;;  %v4794_v42 = vmul.f32 %v376_v34, %v4789_v40  ;;  %v387_v43 = vsel %vm383_vm3, %v4784_v39, 0.0  ;;  %4164 = vmatpush3.msra.mxu1 %v81_v54 }
  0x35   :  { %4148 = vmatpush3.msra.mxu0 %v74_v18 }
  0x36   :  { %4149 = vmatprep.subr.mxu0 %v73_v22  ;;  %v390_v41 = vsel %vm383_vm3, %v4781_v38, 0.0  ;;  %v393_v44 = vsel %vm383_vm3, %v4794_v42, 0.0 }
  0x37   :  { %4150 = vmatpush3.msra.mxu0 %v73_v22 }
  0x49   :  { %385 = vadd.xlane.f32.xlu0 %v384_v37 }
  0x4d   :  { %391 = vadd.xlane.f32.xlu0 %v390_v41 }
  0x4e   :  { %388 = vadd.xlane.f32.xlu1 %v387_v43 }
  0x51   :  { %394 = vadd.xlane.f32.xlu0 %v393_v44 }
  0x5f   :  { %112 = vperm.xlu1 %4463, %v4725_v1  }
  0x63   :  { %118 = vperm.xlu1 %4463, %v4730_v2  }
  0x67   :  { %121 = vperm.xlu1 %4463, %v4742_v6   ;;  %115 = vperm.xlu0 %4464, %v4737_v5  }
  0x6b   :  { %576 = vperm.xlu1 %4463, %v570_v46  }
  0x6f   :  { %4466 = vperm.xlu1 %4463, %v4465_v48  }
  0x73   :  { %581 = vperm.xlu1 %4463, %v571_v49  }
  0x77   :  { %586 = vperm.xlu1 %4463, %v572_v52  }
  0x7b   :  { %4471 = vperm.xlu1 %4463, %v4470_v23  }
  0x7f   :  { %591 = vperm.xlu1 %4463, %v573_v55  }
  0xa1   :  { %v89_v57 = vpop.permute.xlu0 %88  ;;  %v95_v58 = vpop.permute.xlu1 %94 }
  0xa2   :  { %vm99_vm7 = vcmp.eq.s32.totalorder %v86_v56, %v89_v57  ;;  %vm101_vm8 = vcmp.eq.s32.totalorder %v86_v56, %v95_v58 }
  0xa3   :  { %v3822_v59 = vsel %vm99_vm7, 1.0, %v4673_v19  ;;  %v3824_v62 = vsel %vm101_vm8, 1.0, %v4673_v19 }
  0xa4   :  { %4151 = vmatprep.mubr.msk.f32.mxu0 %vm135_vm6, %v3822_v59 }
  0xa5   :  { %v92_v60 = vpop.permute.xlu0 %91  ;;  %v98_v61 = vpop.permute.xlu1 %97 }
  0xa6   :  { %vm100_vm9 = vcmp.eq.s32.totalorder %v86_v56, %v92_v60  ;;  %vm102_vm10 = vcmp.eq.s32.totalorder %v86_v56, %v98_v61 }
  0xa7   :  { %v3823_v63 = vsel %vm100_vm9, 1.0, %v4673_v19  ;;  %v3825_v0 = vsel %vm102_vm10, 1.0, %v4673_v19 }
  0xa8   :  { %4152 = vmatmul.mubr.msk.f32.vlgmr.msra.gmra.mxu0 %vm135_vm6, %v3823_v63 }
  0xa9   :  { %4154 = vmatprep.mubr.msk.f32.mxu0 %vm135_vm6, %v3824_v62 }
  0xac   :  { %4155 = vmatmul.mubr.msk.f32.gmra.mxu0 %vm135_vm6, %v3825_v0 }
  0xd2   :  { %v386_v1 = vpop.xlane.xlu0 %385 }
  0xd3   :  { %v396_v2 = vadd.f32 1e-10, %v386_v1 }
  0xd5   :  { %4475 = vrcp.f32 %v396_v2 }
  0xd6   :  { %v392_v3 = vpop.xlane.xlu0 %391 }
  0xd7   :  { %v389_v4 = vpop.xlane.xlu1 %388  ;;  %v398_v17 = vadd.f32 1e-10, %v392_v3 }
  0xd8   :  { %v397_v16 = vadd.f32 1e-10, %v389_v4 }
  0xda   :  { %v395_v6 = vpop.xlane.xlu0 %394  ;;  %4477 = vrcp.f32 %v397_v16 }
  0xdb   :  { %v113_v5 = vpop.permute.xlu1 %112  ;;  %v399_v18 = vadd.f32 1e-10, %v395_v6  ;;  %4479 = vrcp.f32 %v398_v17 }
  0xdc   :  { %vm123_vm12 = vcmp.eq.s32.totalorder %v86_v56, %v113_v5 }
  0xdd   :  { %v3826_v7 = vsel %vm123_vm12, 1.0, %v4673_v19  ;;  %4481 = vrcp.f32 %v399_v18 }
  0xde   :  { %4165 = vmatprep.mubr.msk.f32.mxu1 %vm233_vm11, %v3826_v7 }
  0xdf   :  { %v119_v8 = vpop.permute.xlu1 %118 }
  0xe0   :  { %vm125_vm13 = vcmp.eq.s32.totalorder %v86_v56, %v119_v8 }
  0xe1   :  { %v3828_v11 = vsel %vm125_vm13, 1.0, %v4673_v19 }
  0xe2   :  { %v116_v9 = vpop.permute.xlu0 %115  ;;  %v4476_v10 = vpop.eup %4475 }
  0xe3   :  { %v122_v12 = vpop.permute.xlu1 %121  ;;  %vm124_vm14 = vcmp.eq.s32.totalorder %v86_v56, %v116_v9  ;;  %v404_v15 = vmul.f32 %v4476_v10, %v4766_v33 }
  0xe4   :  { %vm126_vm15 = vcmp.eq.s32.totalorder %v86_v56, %v122_v12  ;;  %v3827_v13 = vsel %vm124_vm14, 1.0, %v4673_v19  ;;  %v3847_v56 = vld [vmem:[#allocation6] ss:$0 sm:$0xff] }
  0xe5   :  { %4166 = vmatmul.mubr.msk.f32.vlgmr.msra.gmra.mxu1 %vm233_vm11, %v3827_v13  ;;  %v3829_v14 = vsel %vm126_vm15, 1.0, %v4673_v19 }
  0xe6   :  { %4168 = vmatprep.mubr.msk.f32.mxu1 %vm233_vm11, %v3828_v11 }
  0xe7   :  { %v4478_v20 = vpop.eup %4477  ;;  %v577_v30 = vpop.permute.xlu1 %576 }
  0xe8   :  { %v4480_v22 = vpop.eup %4479  ;;  %v405_v23 = vmul.f32 %v4478_v20, %v4784_v39 }
  0xe9   :  { %4169 = vmatmul.mubr.msk.f32.gmra.mxu1 %vm233_vm11, %v3829_v14  ;;  %v406_v27 = vmul.f32 %v4480_v22, %v4781_v38 }
  0xea   :  { %4175 = vmatprep.mubr.msk.f32.mxu1 %vm383_vm3, %v404_v15  ;;  %v4482_v25 = vpop.eup %4481 }
  0xeb   :  { %v407_v29 = vmul.f32 %v4482_v25, %v4794_v42  ;;  %v4467_v32 = vpop.permute.xlu1 %4466 }
  0xec   :  { %v4469_v44 = vunpack.i.h.bf16 %v4467_v32  ;;  %v4468_v48 = vunpack.i.l.bf16 %v4467_v32 }
  0xef   :  { %v582_v33 = vpop.permute.xlu1 %581 }
  0xf3   :  { %v587_v39 = vpop.permute.xlu1 %586 }
  0xf7   :  { %v4472_v41 = vpop.permute.xlu1 %4471 }
  0xf8   :  { %v4474_v52 = vunpack.i.h.bf16 %v4472_v41  ;;  %v4473_v55 = vunpack.i.l.bf16 %v4472_v41  ;;  %v718_v41 = vld [vmem:[#allocation2] sm:$0xff] }
  0xfb   :  { %v592_v53 = vpop.permute.xlu1 %591 }
 0x168   :  { %v4153_v21 = vpop.f32.mrf.mxu0 }
 0x169   :  { %4171 = vmatprep.subr.mxu1 %v4153_v21  ;;  %v595_v46 = vmul.f32 %v4153_v21, %v582_v33 }
 0x16a   :  { %v214_v24 = vpop.f32.mrf.mxu0  ;;  %4172 = vmatpush3.msra.mxu1 %v4153_v21 }
 0x16b   :  { %4173 = vmatprep.subr.mxu1 %v214_v24  ;;  %v594_v50 = vmul.f32 %v577_v30, %v214_v24 }
 0x16c   :  { %v4156_v26 = vpop.f32.mrf.mxu0  ;;  %4174 = vmatpush3.msra.mxu1 %v214_v24 }
 0x16d   :  { %4176 = vmatmul.mubr.msk.f32.vlgmr.msra.gmra.mxu1 %vm383_vm3, %v405_v23  ;;  %4178 = vmatprep.subr.mxu1 %v4156_v26  ;;  %v597_v57 = vmul.f32 %v4156_v26, %v592_v53 }
 0x16e   :  { %v224_v28 = vpop.f32.mrf.mxu0  ;;  %4179 = vmatpush3.msra.mxu1 %v4156_v26  ;;  %4182 = vmatprep.mubr.msk.f32.mxu1 %vm383_vm3, %v406_v27 }
 0x16f   :  { %4180 = vmatprep.subr.mxu1 %v224_v28  ;;  %v596_v61 = vmul.f32 %v587_v39, %v224_v28  ;;  %v720_v39 = vld [vmem:[#allocation2 + $0x10] sm:$0xff] }
 0x170   :  { %4181 = vmatpush3.msra.mxu1 %v224_v28 }
 0x171   :  { %4183 = vmatmul.mubr.msk.f32.vlgmr.msra.gmra.mxu1 %vm383_vm3, %v407_v29 }
 0x1a5   :  { %v4167_v34 = vpop.f32.mrf.mxu1 }
 0x1a7   :  { %v312_v37 = vpop.f32.mrf.mxu1 }
 0x1a9   :  { %v4170_v38 = vpop.f32.mrf.mxu1 }
 0x1ab   :  { %v322_v43 = vpop.f32.mrf.mxu1 }
 0x22d   :  { %v4177_v45 = vpop.f32.mrf.mxu1 }
 0x22e   :  { %v619_v47 = vmul.f32 %v4469_v44, %v4177_v45 }
 0x22f   :  { %v480_v49 = vpop.f32.mrf.mxu1 }
 0x230   :  { %v623_v42 = vadd.f32 %v619_v47, %v595_v46  ;;  %v618_v51 = vmul.f32 %v4468_v48, %v480_v49 }
 0x231   :  { %v4184_v54 = vpop.f32.mrf.mxu1 }
 0x232   :  { %v622_v58 = vadd.f32 %v618_v51, %v594_v50  ;;  %v621_v59 = vmul.f32 %v4474_v52, %v4184_v54  ;;  %v628_v60 = vadd.f32 %v4167_v34, %v623_v42 }
 0x233   :  { %v561_v62 = vpop.f32.mrf.mxu1 }
 0x234   :  { %v625_v63 = vadd.f32 %v621_v59, %v597_v57  ;;  %v620_v0 = vmul.f32 %v4473_v55, %v561_v62  ;;  %v636_v1 = vadd.f32 %v3847_v56, %v628_v60  ;;  %v627_v2 = vadd.f32 %v622_v58, %v312_v37  ;;  %v721_v37 = vld [vmem:[#allocation2 + $0x18] sm:$0xff]  ;;  %v3849_v60 = vld [vmem:[#allocation6 + $0x2] ss:$0 sm:$0xff] }
 0x235   :  { %4185 = vmatprep.subr.mxu0 %v721_v37 }
 0x236   :  { %v624_v3 = vadd.f32 %v620_v0, %v596_v61  ;;  %v644_v4 = vsel %vm233_vm11, %v636_v1, 0.0  ;;  %v635_v5 = vadd.f32 %v3847_v56, %v627_v2  ;;  %v630_v8 = vadd.f32 %v4170_v38, %v625_v63  ;;  %4186 = vmatpush3.msra.mxu0 %v721_v37  ;;  %v719_v38 = vld [vmem:[#allocation2 + $0x8] sm:$0xff] }
 0x237   :  { %645 = vadd.xlane.f32.xlu1 %v644_v4  ;;  %4187 = vmatprep.subr.mxu0 %v720_v39  ;;  %v712_v37 = vsub.f32 1.0, %v4771_v35 }
 0x238   :  { %v641_v6 = vsel %vm233_vm11, %v635_v5, 0.0  ;;  %v629_v7 = vadd.f32 %v624_v3, %v322_v43  ;;  %v638_v11 = vadd.f32 %v3847_v56, %v630_v8  ;;  %4188 = vmatpush3.msra.mxu0 %v720_v39  ;;  %v3850_v8 = vld [vmem:[#allocation6 + $0x8] ss:$0 sm:$0xff] }
 0x239   :  { %642 = vadd.xlane.f32.xlu0 %v641_v6  ;;  %4189 = vmatprep.subr.mxu0 %v719_v38 }
 0x23a   :  { %v637_v9 = vadd.f32 %v3847_v56, %v629_v7  ;;  %v650_v12 = vsel %vm233_vm11, %v638_v11, 0.0  ;;  %4190 = vmatpush3.msra.mxu0 %v719_v38  ;;  %v3848_v56 = vld [vmem:[#allocation6 + $0x1] ss:$0 sm:$0xff]  ;;  %v713_v38 = vsub.f32 1.0, %v4789_v40 }
 0x23b   :  { %4191 = vmatprep.subr.mxu0 %v718_v41 }
 0x23c   :  { %v647_v10 = vsel %vm233_vm11, %v637_v9, 0.0  ;;  %4192 = vmatpush3.msra.mxu0 %v718_v41 }
 0x23d   :  { %648 = vadd.xlane.f32.xlu0 %v647_v10 }
 0x241   :  { %651 = vadd.xlane.f32.xlu0 %v650_v12 }
 0x2c0   :  { %v646_v13 = vpop.xlane.xlu1 %645 }
 0x2c1   :  { %v655_v14 = vmul.f32 0.03125, %v646_v13 }
 0x2c2   :  { %v643_v15 = vpop.xlane.xlu0 %642 }
 0x2c3   :  { %v659_v16 = vsub.f32 %v636_v1, %v655_v14  ;;  %v654_v17 = vmul.f32 0.03125, %v643_v15 }
 0x2c5   :  { %v658_v18 = vsub.f32 %v635_v5, %v654_v17  ;;  %v663_v20 = vmul.f32 %v659_v16, %v659_v16 }
 0x2c6   :  { %v649_v21 = vpop.xlane.xlu0 %648 }
 0x2c7   :  { %v656_v22 = vmul.f32 0.03125, %v649_v21  ;;  %v669_v23 = vsel %vm233_vm11, %v663_v20, 0.0  ;;  %v662_v24 = vmul.f32 %v658_v18, %v658_v18 }
 0x2c8   :  { %670 = vadd.xlane.f32.xlu0 %v669_v23 }
 0x2c9   :  { %v660_v25 = vsub.f32 %v637_v9, %v656_v22  ;;  %v666_v26 = vsel %vm233_vm11, %v662_v24, 0.0 }
 0x2ca   :  { %667 = vadd.xlane.f32.xlu1 %v666_v26  ;;  %v652_v27 = vpop.xlane.xlu0 %651 }
 0x2cb   :  { %v657_v28 = vmul.f32 0.03125, %v652_v27  ;;  %v664_v29 = vmul.f32 %v660_v25, %v660_v25 }
 0x2cd   :  { %v661_v30 = vsub.f32 %v638_v11, %v657_v28  ;;  %v672_v32 = vsel %vm233_vm11, %v664_v29, 0.0 }
 0x2ce   :  { %673 = vadd.xlane.f32.xlu1 %v672_v32  ;;  %v710_v32 = vsub.f32 1.0, %v4763_v31 }
 0x2cf   :  { %v665_v33 = vmul.f32 %v661_v30, %v661_v30 }
 0x2d1   :  { %v675_v34 = vsel %vm233_vm11, %v665_v33, 0.0 }
 0x2d2   :  { %676 = vadd.xlane.f32.xlu0 %v675_v34  ;;  %v4934_v34 = vmul.f32 -1e+09, %v710_v32 }
 0x351   :  { %v671_v43 = vpop.xlane.xlu0 %670 }
 0x352   :  { %v679_v44 = vmul.f32 0.03125, %v671_v43 }
 0x353   :  { %v668_v45 = vpop.xlane.xlu1 %667 }
 0x354   :  { %v683_v46 = vadd.f32 1e-05, %v679_v44  ;;  %v678_v47 = vmul.f32 0.03125, %v668_v45  ;;  %v4939_v44 = vmul.f32 -1e+09, %v712_v37 }
 0x356   :  { %4483 = vrsqrt.f32 %v683_v46  ;;  %v682_v48 = vadd.f32 1e-05, %v678_v47  ;;  %v4943_v46 = vmul.f32 -1e+09, %v713_v38 }
 0x357   :  { %v674_v49 = vpop.xlane.xlu1 %673 }
 0x358   :  { %4485 = vrsqrt.f32 %v682_v48  ;;  %v680_v50 = vmul.f32 0.03125, %v674_v49 }
 0x35a   :  { %v684_v42 = vadd.f32 1e-05, %v680_v50 }
 0x35b   :  { %v677_v51 = vpop.xlane.xlu0 %676 }
 0x35c   :  { %4487 = vrsqrt.f32 %v684_v42  ;;  %v681_v52 = vmul.f32 0.03125, %v677_v51 }
 0x35e   :  { %v685_v53 = vadd.f32 1e-05, %v681_v52 }
 0x360   :  { %4489 = vrsqrt.f32 %v685_v53 }
 0x363   :  { %v4484_v54 = vpop.eup %4483 }
 0x364   :  { %v691_v55 = vmul.f32 %v4484_v54, %v659_v16 }
 0x365   :  { %v4486_v57 = vpop.eup %4485 }
 0x366   :  { %v690_v58 = vmul.f32 %v4486_v57, %v658_v18  ;;  %v699_v59 = vmul.f32 %v3848_v56, %v691_v55 }
 0x368   :  { %v698_v61 = vmul.f32 %v3848_v56, %v690_v58  ;;  %v4844_v1 = vadd.f32 %v3849_v60, %v699_v59 }
 0x369   :  { %v4488_v62 = vpop.eup %4487 }
 0x36a   :  { %v4842_v63 = vadd.f32 %v3849_v60, %v698_v61  ;;  %v692_v0 = vmul.f32 %v4488_v62, %v660_v25 }
 0x36c   :  { %4193 = vmatprep.mubr.msk.f32.mxu0 %vm233_vm11, %v4842_v63  ;;  %v700_v2 = vmul.f32 %v3848_v56, %v692_v0 }
 0x36d   :  { %v4490_v3 = vpop.eup %4489  ;;  %4194 = vmatmul.mubr.msk.f32.vlgmr.msra.gmra.mxu0 %vm233_vm11, %v4844_v1 }
 0x36e   :  { %v4850_v4 = vadd.f32 %v3849_v60, %v700_v2  ;;  %v693_v5 = vmul.f32 %v4490_v3, %v661_v30  ;;  %v711_v30 = vsub.f32 1.0, %v4776_v36 }
 0x370   :  { %4196 = vmatprep.mubr.msk.f32.mxu0 %vm233_vm11, %v4850_v4  ;;  %v701_v6 = vmul.f32 %v3848_v56, %v693_v5  ;;  %v4932_v33 = vmul.f32 -1e+09, %v711_v30 }
 0x372   :  { %v4854_v7 = vadd.f32 %v3849_v60, %v701_v6 }
 0x374   :  { %4197 = vmatmul.mubr.msk.f32.gmra.mxu0 %vm233_vm11, %v4854_v7 }
 0x42d   :  { %v4195_v9 = vpop.f32.mrf.mxu0 }
 0x42e   :  { %v4858_v10 = vadd.f32 %v4195_v9, %v3850_v8 }
 0x42f   :  { %v828_v11 = vpop.f32.mrf.mxu0 }
 0x430   :  { %v4860_v12 = vadd.f32 %v3850_v8, %v828_v11  ;;  %853 = vrot.lane.b32.xlu1 %v4858_v10, %s4674_s2 }
 0x432   :  { %851 = vrot.lane.b32.xlu0 %v4860_v12, %s4674_s2  ;;  %4203 = vmatprep.mubr.msk.f32.mxu1 %vm383_vm3, %v4860_v12 }
 0x434   :  { %v4198_v13 = vpop.f32.mrf.mxu0 }
 0x435   :  { %v4868_v14 = vadd.f32 %v4198_v13, %v3850_v8 }
 0x436   :  { %861 = vrot.lane.b32.xlu0 %v4858_v10, %s4675_s27  ;;  %v838_v15 = vpop.f32.mrf.mxu0 }
 0x437   :  { %v4872_v16 = vadd.f32 %v3850_v8, %v838_v15  ;;  %857 = vrot.lane.b32.xlu1 %v4868_v14, %s4674_s2 }
 0x439   :  { %4210 = vmatprep.mubr.msk.f32.mxu0 %vm383_vm3, %v4872_v16 }
 0x43a   :  { %948 = vrot.lane.b32.xlu0 %v4868_v14, %s4675_s27 }
 0x43b   :  { %855 = vrot.lane.b32.xlu1 %v4872_v16, %s4674_s2 }
 0x43f   :  { %859 = vrot.lane.b32.xlu1 %v4860_v12, %s4675_s27 }
 0x443   :  { %946 = vrot.lane.b32.xlu1 %v4872_v16, %s4675_s27 }
 0x4a2   :  { %v4886_v17 = vpop.permute.xlu1 %853 }
 0x4a3   :  { %1035 = vrot.lane.b32.xlu0 %v4886_v17, %s4675_s27 }
 0x4a4   :  { %v4890_v18 = vpop.permute.xlu0 %851 }
 0x4a5   :  { %1033 = vrot.lane.b32.xlu1 %v4890_v18, %s4675_s27 }
 0x4a8   :  { %v862_v20 = vpop.permute.xlu0 %861 }
 0x4a9   :  { %v4894_v21 = vpop.permute.xlu1 %857  ;;  %4199 = vmatprep.subr.msk.mxu1 %vm383_vm3, %v862_v20 }
 0x4aa   :  { %1122 = vrot.lane.b32.xlu0 %v4894_v21, %s4675_s27  ;;  %4200 = vmatpush3.xpose.msk.msra.mxu1 %vm383_vm3, %v862_v20 }
 0x4ac   :  { %v949_v22 = vpop.permute.xlu0 %948 }
 0x4ad   :  { %v4900_v23 = vpop.permute.xlu1 %855  ;;  %4206 = vmatprep.subr.msk.mxu0 %vm383_vm3, %v949_v22 }
 0x4ae   :  { %1120 = vrot.lane.b32.xlu1 %v4900_v23, %s4675_s27  ;;  %4207 = vmatpush3.xpose.msk.msra.mxu0 %vm383_vm3, %v949_v22 }
 0x4b1   :  { %v860_v24 = vpop.permute.xlu1 %859 }
 0x4b2   :  { %4201 = vmatprep.subr.msk.mxu1 %vm383_vm3, %v860_v24 }
 0x4b3   :  { %4202 = vmatpush3.xpose.msk.msra.mxu1 %vm383_vm3, %v860_v24 }
 0x4b5   :  { %v947_v25 = vpop.permute.xlu1 %946 }
 0x4b6   :  { %4204 = vmatmul.mubr.msk.f32.vlgmr.msra.gmra.mxu1 %vm383_vm3, %v4858_v10  ;;  %4208 = vmatprep.subr.msk.mxu0 %vm383_vm3, %v947_v25 }
 0x4b7   :  { %4209 = vmatpush3.xpose.msk.msra.mxu0 %vm383_vm3, %v947_v25  ;;  %4217 = vmatprep.mubr.msk.f32.mxu1 %vm383_vm3, %v4890_v18 }
 0x4ba   :  { %4211 = vmatmul.mubr.msk.f32.vlgmr.msra.gmra.mxu0 %vm383_vm3, %v4868_v14 }
 0x4bb   :  { %4224 = vmatprep.mubr.msk.f32.mxu0 %vm383_vm3, %v4900_v23 }
 0x515   :  { %v1036_v26 = vpop.permute.xlu0 %1035 }
 0x516   :  { %4213 = vmatprep.subr.msk.mxu1 %vm383_vm3, %v1036_v26 }
 0x517   :  { %v1034_v27 = vpop.permute.xlu1 %1033  ;;  %4214 = vmatpush3.xpose.msk.msra.mxu1 %vm383_vm3, %v1036_v26 }
 0x518   :  { %4215 = vmatprep.subr.msk.mxu1 %vm383_vm3, %v1034_v27 }
 0x51b   :  { %4216 = vmatpush3.xpose.msk.msra.mxu1 %vm383_vm3, %v1034_v27 }
 0x51c   :  { %v1123_v28 = vpop.permute.xlu0 %1122 }
 0x51d   :  { %4220 = vmatprep.subr.msk.mxu0 %vm383_vm3, %v1123_v28 }
 0x51e   :  { %4218 = vmatmul.mubr.msk.f32.vlgmr.msra.gmra.mxu1 %vm383_vm3, %v4886_v17  ;;  %4221 = vmatpush3.xpose.msk.msra.mxu0 %vm383_vm3, %v1123_v28 }
 0x520   :  { %v1121_v29 = vpop.permute.xlu1 %1120 }
 0x521   :  { %4222 = vmatprep.subr.msk.mxu0 %vm383_vm3, %v1121_v29 }
 0x522   :  { %4223 = vmatpush3.xpose.msk.msra.mxu0 %vm383_vm3, %v1121_v29 }
 0x525   :  { %4225 = vmatmul.mubr.msk.f32.vlgmr.msra.gmra.mxu0 %vm383_vm3, %v4894_v21 }
 0x576   :  { %v4205_v39 = vpop.f32.mrf.mxu1 }
 0x577   :  { %v943_v41 = vadd.f32 %v4205_v39, %v4932_v33 }
 0x578   :  { %v937_v43 = vpop.f32.mrf.mxu1 }
 0x579   :  { %v938_v45 = vadd.f32 %v937_v43, %v4934_v34  ;;  %v1210_v36 = vsel %vm383_vm3, %v943_v41, -inf }
 0x57a   :  { %1211 = vmax.xlane.f32.xlu1 %v1210_v36  ;;  %v4212_v31 = vpop.f32.mrf.mxu0 }
 0x57b   :  { %v1207_v47 = vsel %vm383_vm3, %v938_v45, -inf  ;;  %v1030_v40 = vadd.f32 %v4212_v31, %v4943_v46 }
 0x57c   :  { %1208 = vmax.xlane.f32.xlu0 %v1207_v47  ;;  %v1024_v35 = vpop.f32.mrf.mxu0 }
 0x57d   :  { %v1025_v48 = vadd.f32 %v1024_v35, %v4939_v44  ;;  %v1216_v50 = vsel %vm383_vm3, %v1030_v40, -inf }
 0x57f   :  { %v1213_v49 = vsel %vm383_vm3, %v1025_v48, -inf }
 0x580   :  { %1214 = vmax.xlane.f32.xlu0 %v1213_v49 }
 0x584   :  { %1217 = vmax.xlane.f32.xlu0 %v1216_v50 }
 0x5de   :  { %v4219_v42 = vpop.f32.mrf.mxu1 }
 0x5df   :  { %v1117_v51 = vadd.f32 %v4219_v42, %v4932_v33 }
 0x5e0   :  { %v1111_v52 = vpop.f32.mrf.mxu1 }
 0x5e1   :  { %v1112_v53 = vadd.f32 %v1111_v52, %v4934_v34  ;;  %v1222_v54 = vsel %vm383_vm3, %v1117_v51, -inf }
 0x5e2   :  { %1223 = vmax.xlane.f32.xlu0 %v1222_v54 }
 0x5e3   :  { %v1219_v55 = vsel %vm383_vm3, %v1112_v53, -inf }
 0x5e4   :  { %1220 = vmax.xlane.f32.xlu1 %v1219_v55 }
 0x5e5   :  { %v4226_v56 = vpop.f32.mrf.mxu0 }
 0x5e6   :  { %v1204_v57 = vadd.f32 %v4226_v56, %v4943_v46 }
 0x5e7   :  { %v1198_v58 = vpop.f32.mrf.mxu0 }
 0x5e8   :  { %v1199_v59 = vadd.f32 %v1198_v58, %v4939_v44  ;;  %v1228_v60 = vsel %vm383_vm3, %v1204_v57, -inf }
 0x5e9   :  { %1229 = vmax.xlane.f32.xlu0 %v1228_v60 }
 0x5ea   :  { %v1225_v61 = vsel %vm383_vm3, %v1199_v59, -inf }
 0x5eb   :  { %1226 = vmax.xlane.f32.xlu1 %v1225_v61 }
 0x5fc   :  { %1297 = vrot.lane.b32.xlu1 %v4858_v10, %s4676_s28 }
 0x5ff   :  { %1295 = vrot.lane.b32.xlu0 %v4860_v12, %s4676_s28 }
 0x600   :  { %1384 = vrot.lane.b32.xlu1 %v4868_v14, %s4676_s28 }
 0x603   :  { %1471 = vrot.lane.b32.xlu0 %v4886_v17, %s4676_s28  ;;  %v1212_v0 = vpop.xlane.xlu1 %1211 }
 0x604   :  { %1382 = vrot.lane.b32.xlu1 %v4872_v16, %s4676_s28  ;;  %v1232_v2 = vsub.f32 %v943_v41, %v1212_v0 }
 0x605   :  { %v1209_v62 = vpop.xlane.xlu0 %1208 }
 0x606   :  { %v1241_v5 = vmul.f32 1.442695, %v1232_v2  ;;  %v1231_v10 = vsub.f32 %v938_v45, %v1209_v62 }
 0x608   :  { %1469 = vrot.lane.b32.xlu1 %v4890_v18, %s4676_s28  ;;  %4491 = vpow2.f32 %v1241_v5  ;;  %v1239_v11 = vmul.f32 1.442695, %v1231_v10 }
 0x609   :  { %v1215_v3 = vpop.xlane.xlu0 %1214 }
 0x60a   :  { %v1233_v12 = vsub.f32 %v1025_v48, %v1215_v3  ;;  %v723_v3 = vld [vmem:[#allocation2 + $0x28] sm:$0xff] }
 0x60c   :  { %v1243_v13 = vmul.f32 1.442695, %v1233_v12 }
 0x60d   :  { %v1218_v6 = vpop.xlane.xlu0 %1217 }
 0x60e   :  { %v1234_v8 = vsub.f32 %v1030_v40, %v1218_v6 }
 0x610   :  { %v1245_v9 = vmul.f32 1.442695, %v1234_v8 }
 0x612   :  { %4493 = vpow2.f32 %v1245_v9 }
 0x613   :  { %4495 = vpow2.f32 %v1239_v11 }
 0x614   :  { %4497 = vpow2.f32 %v1243_v13 }
 0x615   :  { %v4970_v14 = vpop.eup %4491 }
 0x616   :  { %v1258_v15 = vsel %vm383_vm3, %v4970_v14, 0.0 }
 0x61f   :  { %v4974_v16 = vpop.eup %4493 }
 0x620   :  { %v1264_v17 = vsel %vm383_vm3, %v4974_v16, 0.0  ;;  %v4496_v18 = vpop.eup %4495 }
 0x621   :  { %v1255_v20 = vsel %vm383_vm3, %v4496_v18, 0.0  ;;  %v4498_v22 = vpop.eup %4497 }
 0x622   :  { %1259 = vadd.xlane.f32.xlu0 %v1258_v15  ;;  %v1261_v24 = vsel %vm383_vm3, %v4498_v22, 0.0 }
 0x626   :  { %1265 = vadd.xlane.f32.xlu0 %v1264_v17 }
 0x62c   :  { %1256 = vadd.xlane.f32.xlu1 %v1255_v20 }
 0x630   :  { %1262 = vadd.xlane.f32.xlu1 %v1261_v24  ;;  %v725_v24 = vld [vmem:[#allocation2 + $0x38] sm:$0xff] }
 0x66b   :  { %v1224_v25 = vpop.xlane.xlu0 %1223 }
 0x66c   :  { %v1236_v26 = vsub.f32 %v1117_v51, %v1224_v25  ;;  %v724_v25 = vld [vmem:[#allocation2 + $0x30] sm:$0xff] }
 0x66d   :  { %v1221_v27 = vpop.xlane.xlu1 %1220 }
 0x66e   :  { %v1249_v28 = vmul.f32 1.442695, %v1236_v26  ;;  %v1235_v29 = vsub.f32 %v1112_v53, %v1221_v27 }
 0x670   :  { %4499 = vpow2.f32 %v1249_v28  ;;  %v1247_v30 = vmul.f32 1.442695, %v1235_v29 }
 0x672   :  { %4501 = vpow2.f32 %v1247_v30  ;;  %v1230_v32 = vpop.xlane.xlu0 %1229 }
 0x673   :  { %v1238_v37 = vsub.f32 %v1204_v57, %v1230_v32 }
 0x674   :  { %v1227_v39 = vpop.xlane.xlu1 %1226 }
 0x675   :  { %v1253_v38 = vmul.f32 1.442695, %v1238_v37  ;;  %v1237_v41 = vsub.f32 %v1199_v59, %v1227_v39 }
 0x676   :  { %v1296_v36 = vpop.permute.xlu0 %1295 }
 0x677   :  { %4503 = vpow2.f32 %v1253_v38  ;;  %v1251_v43 = vmul.f32 1.442695, %v1237_v41  ;;  %v3883_v41 = vld [vmem:[#allocation6 + $0x9] ss:$0 sm:$0xff] }
 0x678   :  { %v1298_v45 = vpop.permute.xlu1 %1297 }
 0x679   :  { %4505 = vpow2.f32 %v1251_v43  ;;  %4227 = vmatprep.subr.mxu1 %v1298_v45 }
 0x67a   :  { %4228 = vmatpush3.msra.mxu1 %v1298_v45  ;;  %v1472_v53 = vpop.permute.xlu0 %1471 }
 0x67b   :  { %4229 = vmatprep.subr.mxu1 %v1296_v36 }
 0x67c   :  { %v1385_v31 = vpop.permute.xlu1 %1384  ;;  %4230 = vmatpush3.msra.mxu1 %v1296_v36 }
 0x67d   :  { %v4980_v47 = vpop.eup %4499  ;;  %4234 = vmatprep.subr.mxu1 %v1385_v31 }
 0x67e   :  { %v1270_v35 = vsel %vm383_vm3, %v4980_v47, 0.0 }
 0x67f   :  { %v4502_v48 = vpop.eup %4501  ;;  %1271 = vadd.xlane.f32.xlu0 %v1270_v35 }
 0x680   :  { %v1267_v40 = vsel %vm383_vm3, %v4502_v48, 0.0  ;;  %v1383_v52 = vpop.permute.xlu1 %1382 }
 0x681   :  { %1268 = vadd.xlane.f32.xlu1 %v1267_v40 }
 0x684   :  { %v4985_v49 = vpop.eup %4503  ;;  %v1470_v55 = vpop.permute.xlu1 %1469 }
 0x685   :  { %v1276_v50 = vsel %vm383_vm3, %v4985_v49, 0.0 }
 0x686   :  { %v4989_v42 = vpop.eup %4505  ;;  %1277 = vadd.xlane.f32.xlu0 %v1276_v50 }
 0x687   :  { %v1273_v51 = vsel %vm383_vm3, %v4989_v42, 0.0 }
 0x688   :  { %1274 = vadd.xlane.f32.xlu1 %v1273_v51 }
 0x699   :  { %1556 = vrot.lane.b32.xlu1 %v4900_v23, %s4676_s28 }
 0x69c   :  { %1558 = vrot.lane.b32.xlu0 %v4894_v21, %s4676_s28 }
 0x6ab   :  { %v1260_v54 = vpop.xlane.xlu0 %1259 }
 0x6ac   :  { %4507 = vrcp.f32 %v1260_v54 }
 0x6af   :  { %v1266_v57 = vpop.xlane.xlu0 %1265 }
 0x6b5   :  { %v1257_v56 = vpop.xlane.xlu1 %1256 }
 0x6b6   :  { %4509 = vrcp.f32 %v1257_v56 }
 0x6b7   :  { %4511 = vrcp.f32 %v1266_v57 }
 0x6b9   :  { %v1263_v58 = vpop.xlane.xlu1 %1262  ;;  %v4508_v59 = vpop.eup %4507 }
 0x6ba   :  { %4513 = vrcp.f32 %v1263_v58  ;;  %v1288_v62 = vmul.f32 %v4508_v59, %v4970_v14 }
 0x6c3   :  { %v4510_v60 = vpop.eup %4509 }
 0x6c4   :  { %v1287_v61 = vmul.f32 %v4510_v60, %v4496_v18  ;;  %v4512_v23 = vpop.eup %4511 }
 0x6c5   :  { %v1290_v2 = vmul.f32 %v4512_v23, %v4974_v16  ;;  %v722_v16 = vld [vmem:[#allocation2 + $0x20] sm:$0xff] }
 0x6c6   :  { %4231 = vmatprep.mubr.msk.f32.mxu1 %vm383_vm3, %v1287_v61 }
 0x6c7   :  { %v4514_v21 = vpop.eup %4513  ;;  %4232 = vmatmul.mubr.msk.f32.vlgmr.msra.gmra.mxu1 %vm383_vm3, %v1288_v62 }
 0x6c8   :  { %4235 = vmatpush3.msra.mxu1 %v1385_v31  ;;  %v1289_v0 = vmul.f32 %v4514_v21, %v4498_v22 }
 0x6c9   :  { %4236 = vmatprep.subr.mxu1 %v1383_v52 }
 0x6ca   :  { %4237 = vmatpush3.msra.mxu1 %v1383_v52  ;;  %4238 = vmatprep.mubr.msk.f32.mxu1 %vm383_vm3, %v1289_v0 }
 0x6cb   :  { %4241 = vmatprep.subr.mxu1 %v1472_v53  ;;  %4239 = vmatmul.mubr.msk.f32.vlgmr.msra.gmra.mxu1 %vm383_vm3, %v1290_v2 }
 0x6cc   :  { %4242 = vmatpush3.msra.mxu1 %v1472_v53 }
 0x6cd   :  { %4243 = vmatprep.subr.mxu1 %v1470_v55 }
 0x6ce   :  { %4244 = vmatpush3.msra.mxu1 %v1470_v55 }
 0x6cf   :  { %4255 = vmatprep.subr.mxu1 %v723_v3 }
 0x708   :  { %v1272_v5 = vpop.xlane.xlu0 %1271 }
 0x709   :  { %4515 = vrcp.f32 %v1272_v5 }
 0x70a   :  { %v1269_v6 = vpop.xlane.xlu1 %1268 }
 0x70b   :  { %4517 = vrcp.f32 %v1269_v6 }
 0x70f   :  { %v1278_v8 = vpop.xlane.xlu0 %1277 }
 0x710   :  { %4519 = vrcp.f32 %v1278_v8 }
 0x711   :  { %v1275_v9 = vpop.xlane.xlu1 %1274 }
 0x712   :  { %4521 = vrcp.f32 %v1275_v9 }
 0x713   :  { %v1559_v10 = vpop.permute.xlu0 %1558 }
 0x714   :  { %4248 = vmatprep.subr.mxu0 %v1559_v10 }
 0x715   :  { %v1557_v11 = vpop.permute.xlu1 %1556  ;;  %4249 = vmatpush3.msra.mxu0 %v1559_v10 }
 0x716   :  { %4250 = vmatprep.subr.mxu0 %v1557_v11  ;;  %v4516_v12 = vpop.eup %4515 }
 0x717   :  { %4251 = vmatpush3.msra.mxu0 %v1557_v11  ;;  %v1292_v15 = vmul.f32 %v4516_v12, %v4980_v47 }
 0x718   :  { %v4518_v13 = vpop.eup %4517  ;;  %4265 = vmatprep.subr.mxu0 %v725_v24 }
 0x719   :  { %v1291_v14 = vmul.f32 %v4518_v13, %v4502_v48 }
 0x71b   :  { %4245 = vmatprep.mubr.msk.f32.mxu1 %vm383_vm3, %v1291_v14 }
 0x71c   :  { %4246 = vmatmul.mubr.msk.f32.vlgmr.msra.gmra.mxu1 %vm383_vm3, %v1292_v15 }
 0x71d   :  { %4256 = vmatpush3.msra.mxu1 %v723_v3  ;;  %v4520_v17 = vpop.eup %4519 }
 0x71e   :  { %4257 = vmatprep.subr.mxu1 %v722_v16  ;;  %v1294_v22 = vmul.f32 %v4520_v17, %v4985_v49  ;;  %v729_v17 = vld [vmem:[#allocation2 + $0x58] sm:$0xff] }
 0x71f   :  { %v4522_v18 = vpop.eup %4521  ;;  %4258 = vmatpush3.msra.mxu1 %v722_v16 }
 0x720   :  { %v1293_v20 = vmul.f32 %v4522_v18, %v4989_v42  ;;  %v728_v18 = vld [vmem:[#allocation2 + $0x50] sm:$0xff]  ;;  %4275 = vmatprep.subr.mxu1 %v729_v17 }
 0x722   :  { %4252 = vmatprep.mubr.msk.f32.mxu0 %vm383_vm3, %v1293_v20  ;;  %v727_v20 = vld [vmem:[#allocation2 + $0x48] sm:$0xff] }
 0x723   :  { %4253 = vmatmul.mubr.msk.f32.vlgmr.msra.gmra.mxu0 %vm383_vm3, %v1294_v22  ;;  %v726_v22 = vld [vmem:[#allocation2 + $0x40] sm:$0xff] }
 0x724   :  { %4266 = vmatpush3.msra.mxu0 %v725_v24 }
 0x725   :  { %4267 = vmatprep.subr.mxu0 %v724_v25 }
 0x726   :  { %4268 = vmatpush3.msra.mxu0 %v724_v25 }
 0x787   :  { %v4233_v26 = vpop.f32.mrf.mxu1 }
 0x789   :  { %v1373_v27 = vpop.f32.mrf.mxu1 }
 0x78a   :  { %4259 = vmatprep.mubr.msk.f32.mxu1 %vm383_vm3, %v1373_v27 }
 0x78b   :  { %v4240_v28 = vpop.f32.mrf.mxu1  ;;  %4260 = vmatmul.mubr.msk.f32.vlgmr.msra.gmra.mxu1 %vm383_vm3, %v4233_v26 }
 0x78c   :  { %4276 = vmatpush3.msra.mxu1 %v729_v17 }
 0x78d   :  { %v1460_v29 = vpop.f32.mrf.mxu1  ;;  %4277 = vmatprep.subr.mxu1 %v728_v18 }
 0x78e   :  { %4262 = vmatprep.mubr.msk.f32.mxu1 %vm383_vm3, %v1460_v29  ;;  %4278 = vmatpush3.msra.mxu1 %v728_v18 }
 0x78f   :  { %4263 = vmatmul.mubr.msk.f32.gmra.mxu1 %vm383_vm3, %v4240_v28  ;;  %4279 = vmatprep.subr.mxu1 %v727_v20 }
 0x790   :  { %4280 = vmatpush3.msra.mxu1 %v727_v20 }
 0x791   :  { %4281 = vmatprep.subr.mxu1 %v726_v22 }
 0x792   :  { %4282 = vmatpush3.msra.mxu1 %v726_v22 }
 0x7dc   :  { %v4247_v30 = vpop.f32.mrf.mxu1 }
 0x7de   :  { %v1547_v32 = vpop.f32.mrf.mxu1 }
 0x7df   :  { %4269 = vmatprep.mubr.msk.f32.mxu0 %vm383_vm3, %v1547_v32 }
 0x7e0   :  { %4270 = vmatmul.mubr.msk.f32.vlgmr.msra.gmra.mxu0 %vm383_vm3, %v4247_v30 }
 0x7e3   :  { %v4254_v37 = vpop.f32.mrf.mxu0 }
 0x7e5   :  { %v1634_v39 = vpop.f32.mrf.mxu0 }
 0x7e6   :  { %4272 = vmatprep.mubr.msk.f32.mxu0 %vm383_vm3, %v1634_v39 }
 0x7e7   :  { %4273 = vmatmul.mubr.msk.f32.gmra.mxu0 %vm383_vm3, %v4254_v37 }
 0x84b   :  { %v4261_v38 = vpop.f32.mrf.mxu1 }
 0x84c   :  { %v1745_v45 = vadd.f32 %v4261_v38, %v3883_v41 }
 0x84d   :  { %v1721_v43 = vpop.f32.mrf.mxu1 }
 0x84e   :  { %v1744_v31 = vadd.f32 %v3883_v41, %v1721_v43 }
 0x84f   :  { %v4264_v47 = vpop.f32.mrf.mxu1 }
 0x850   :  { %v1747_v54 = vadd.f32 %v4264_v47, %v3883_v41 }
 0x851   :  { %v1731_v50 = vpop.f32.mrf.mxu1 }
 0x852   :  { %v1746_v55 = vadd.f32 %v3883_v41, %v1731_v50 }
 0x8a0   :  { %v4271_v36 = vpop.f32.mrf.mxu0 }
 0x8a1   :  { %v1846_v35 = vadd.f32 %v4271_v36, %v1745_v45  ;;  %v3888_v36 = vld [vmem:[#allocation6 + $0xa] ss:$0 sm:$0xff] }
 0x8a2   :  { %v1826_v48 = vpop.f32.mrf.mxu0 }
 0x8a3   :  { %v1845_v40 = vadd.f32 %v1826_v48, %v1744_v31  ;;  %v1850_v49 = vadd.f32 %v1846_v35, %v4844_v1  ;;  %v3889_v48 = vld [vmem:[#allocation6 + $0xb] ss:$0 sm:$0xff] }
 0x8a5   :  { %v1856_v42 = vsel %vm233_vm11, %v1850_v49, 0.0  ;;  %v1849_v51 = vadd.f32 %v1845_v40, %v4842_v63 }
 0x8a6   :  { %1857 = vadd.xlane.f32.xlu1 %v1856_v42 }
 0x8a7   :  { %v4274_v52 = vpop.f32.mrf.mxu0  ;;  %v1853_v53 = vsel %vm233_vm11, %v1849_v51, 0.0 }
 0x8a8   :  { %1854 = vadd.xlane.f32.xlu0 %v1853_v53  ;;  %v1848_v57 = vadd.f32 %v4274_v52, %v1747_v54 }
 0x8a9   :  { %v1836_v56 = vpop.f32.mrf.mxu0 }
 0x8aa   :  { %v1847_v58 = vadd.f32 %v1836_v56, %v1746_v55  ;;  %v1852_v1 = vadd.f32 %v1848_v57, %v4854_v7 }
 0x8ac   :  { %v1851_v59 = vadd.f32 %v1847_v58, %v4850_v4  ;;  %v1862_v61 = vsel %vm233_vm11, %v1852_v1, 0.0  ;;  %v737_v58 = vld [vmem:[#allocation2 + $0x98] sm:$0xff] }
 0x8ad   :  { %4289 = vmatprep.subr.mxu0 %v737_v58 }
 0x8ae   :  { %v1859_v60 = vsel %vm233_vm11, %v1851_v59, 0.0  ;;  %4290 = vmatpush3.msra.mxu0 %v737_v58 }
 0x8af   :  { %1860 = vadd.xlane.f32.xlu0 %v1859_v60  ;;  %v735_v60 = vld [vmem:[#allocation2 + $0x88] sm:$0xff] }
 0x8b3   :  { %1863 = vadd.xlane.f32.xlu0 %v1862_v61  ;;  %v733_v61 = vld [vmem:[#allocation2 + $0x78] sm:$0xff] }
 0x92f   :  { %v1858_v63 = vpop.xlane.xlu1 %1857 }
 0x930   :  { %v1866_v62 = vmul.f32 0.03125, %v1858_v63  ;;  %v732_v63 = vld [vmem:[#allocation2 + $0x70] sm:$0xff] }
 0x931   :  { %v1855_v23 = vpop.xlane.xlu0 %1854 }
 0x932   :  { %v1870_v21 = vsub.f32 %v1850_v49, %v1866_v62  ;;  %v1865_v0 = vmul.f32 0.03125, %v1855_v23  ;;  %v731_v62 = vld [vmem:[#allocation2 + $0x68] sm:$0xff]  ;;  %v730_v23 = vld [vmem:[#allocation2 + $0x60] sm:$0xff] }
 0x934   :  { %v1869_v2 = vsub.f32 %v1849_v51, %v1865_v0  ;;  %v1874_v3 = vmul.f32 %v1870_v21, %v1870_v21 }
 0x936   :  { %v1880_v5 = vsel %vm233_vm11, %v1874_v3, 0.0  ;;  %v1873_v6 = vmul.f32 %v1869_v2, %v1869_v2 }
 0x937   :  { %1881 = vadd.xlane.f32.xlu0 %v1880_v5 }
 0x938   :  { %v1861_v4 = vpop.xlane.xlu0 %1860  ;;  %v1877_v8 = vsel %vm233_vm11, %v1873_v6, 0.0 }
 0x939   :  { %v1867_v9 = vmul.f32 0.03125, %v1861_v4  ;;  %1878 = vadd.xlane.f32.xlu1 %v1877_v8 }
 0x93b   :  { %v1871_v7 = vsub.f32 %v1851_v59, %v1867_v9  ;;  %v736_v59 = vld [vmem:[#allocation2 + $0x90] sm:$0xff] }
 0x93c   :  { %v1864_v10 = vpop.xlane.xlu0 %1863  ;;  %4291 = vmatprep.subr.mxu0 %v736_v59 }
 0x93d   :  { %v1868_v11 = vmul.f32 0.03125, %v1864_v10  ;;  %v1875_v12 = vmul.f32 %v1871_v7, %v1871_v7  ;;  %4292 = vmatpush3.msra.mxu0 %v736_v59 }
 0x93e   :  { %4293 = vmatprep.subr.mxu0 %v735_v60 }
 0x93f   :  { %v1872_v13 = vsub.f32 %v1852_v1, %v1868_v11  ;;  %v1883_v14 = vsel %vm233_vm11, %v1875_v12, 0.0  ;;  %4294 = vmatpush3.msra.mxu0 %v735_v60  ;;  %v734_v1 = vld [vmem:[#allocation2 + $0x80] sm:$0xff] }
 0x940   :  { %1884 = vadd.xlane.f32.xlu1 %v1883_v14  ;;  %4295 = vmatprep.subr.mxu0 %v734_v1 }
 0x941   :  { %v1876_v15 = vmul.f32 %v1872_v13, %v1872_v13  ;;  %4296 = vmatpush3.msra.mxu0 %v734_v1 }
 0x942   :  { %4297 = vmatprep.subr.mxu0 %v733_v61 }
 0x943   :  { %v1886_v16 = vsel %vm233_vm11, %v1876_v15, 0.0  ;;  %4298 = vmatpush3.msra.mxu0 %v733_v61 }
 0x944   :  { %1887 = vadd.xlane.f32.xlu0 %v1886_v16  ;;  %4299 = vmatprep.subr.mxu0 %v732_v63 }
 0x945   :  { %4300 = vmatpush3.msra.mxu0 %v732_v63 }
 0x946   :  { %4301 = vmatprep.subr.mxu0 %v731_v62 }
 0x947   :  { %4302 = vmatpush3.msra.mxu0 %v731_v62 }
 0x948   :  { %4303 = vmatprep.subr.mxu0 %v730_v23 }
 0x949   :  { %4304 = vmatpush3.msra.mxu0 %v730_v23 }
 0x9c0   :  { %v1882_v24 = vpop.xlane.xlu0 %1881 }
 0x9c1   :  { %v1890_v25 = vmul.f32 0.03125, %v1882_v24 }
 0x9c2   :  { %v1879_v26 = vpop.xlane.xlu1 %1878 }
 0x9c3   :  { %v1894_v27 = vadd.f32 1e-05, %v1890_v25  ;;  %v1889_v28 = vmul.f32 0.03125, %v1879_v26 }
 0x9c5   :  { %4523 = vrsqrt.f32 %v1894_v27  ;;  %v1893_v29 = vadd.f32 1e-05, %v1889_v28 }
 0x9c7   :  { %4525 = vrsqrt.f32 %v1893_v29 }
 0x9c9   :  { %v1885_v30 = vpop.xlane.xlu1 %1884 }
 0x9ca   :  { %v1891_v32 = vmul.f32 0.03125, %v1885_v30 }
 0x9cc   :  { %v1895_v37 = vadd.f32 1e-05, %v1891_v32 }
 0x9cd   :  { %v1888_v39 = vpop.xlane.xlu0 %1887 }
 0x9ce   :  { %4527 = vrsqrt.f32 %v1895_v37  ;;  %v1892_v38 = vmul.f32 0.03125, %v1888_v39 }
 0x9d0   :  { %v1896_v41 = vadd.f32 1e-05, %v1892_v38 }
 0x9d2   :  { %v4524_v43 = vpop.eup %4523  ;;  %4529 = vrsqrt.f32 %v1896_v41 }
 0x9d3   :  { %v1902_v45 = vmul.f32 %v4524_v43, %v1870_v21  ;;  %v3890_v21 = vld [vmem:[#allocation6 + $0xc] ss:$0 sm:$0xff] }
 0x9d4   :  { %v4526_v31 = vpop.eup %4525 }
 0x9d5   :  { %v1901_v47 = vmul.f32 %v4526_v31, %v1869_v2  ;;  %v1910_v35 = vmul.f32 %v3888_v36, %v1902_v45 }
 0x9d7   :  { %v1909_v40 = vmul.f32 %v3888_v36, %v1901_v47  ;;  %v5032_v50 = vadd.f32 %v3889_v48, %v1910_v35 }
 0x9d9   :  { %v5030_v49 = vadd.f32 %v3889_v48, %v1909_v40 }
 0x9db   :  { %v4528_v42 = vpop.eup %4527  ;;  %4283 = vmatprep.mubr.msk.f32.mxu1 %vm233_vm11, %v5030_v49 }
 0x9dc   :  { %4284 = vmatmul.mubr.msk.f32.vlgmr.msra.gmra.mxu1 %vm233_vm11, %v5032_v50  ;;  %v1903_v51 = vmul.f32 %v4528_v42, %v1871_v7 }
 0x9de   :  { %v1911_v52 = vmul.f32 %v3888_v36, %v1903_v51 }
 0x9df   :  { %v4530_v53 = vpop.eup %4529 }
 0x9e0   :  { %v5038_v54 = vadd.f32 %v3889_v48, %v1911_v52  ;;  %v1904_v55 = vmul.f32 %v4530_v53, %v1872_v13 }
 0x9e2   :  { %4286 = vmatprep.mubr.msk.f32.mxu1 %vm233_vm11, %v5038_v54  ;;  %v1912_v56 = vmul.f32 %v3888_v36, %v1904_v55  ;;  %v3895_v55 = vld [vmem:[#allocation6 + $0xd] ss:$0 sm:$0xff] }
 0x9e4   :  { %v5042_v57 = vadd.f32 %v3889_v48, %v1912_v56 }
 0x9e6   :  { %4287 = vmatmul.mubr.msk.f32.gmra.mxu1 %vm233_vm11, %v5042_v57 }
 0xa9c   :  { %v4285_v0 = vpop.f32.mrf.mxu1 }
 0xa9d   :  { %v2009_v2 = vadd.f32 %v4285_v0, %v3890_v21 }
 0xa9e   :  { %v2003_v3 = vpop.f32.mrf.mxu1 }
 0xa9f   :  { %v2027_v5 = vmul.f32 0.044715, %v2009_v2  ;;  %v2004_v6 = vadd.f32 %v3890_v21, %v2003_v3  ;;  %v2023_v45 = vmul.f32 0.5, %v2009_v2 }
 0xaa1   :  { %v2031_v4 = vmul.f32 %v2027_v5, %v2009_v2  ;;  %v2026_v8 = vmul.f32 0.044715, %v2004_v6  ;;  %v2022_v41 = vmul.f32 0.5, %v2004_v6 }
 0xaa3   :  { %v2035_v9 = vmul.f32 %v2031_v4, %v2009_v2  ;;  %v2030_v7 = vmul.f32 %v2026_v8, %v2004_v6 }
 0xaa5   :  { %v2039_v10 = vadd.f32 %v2035_v9, %v2009_v2  ;;  %v2034_v11 = vmul.f32 %v2030_v7, %v2004_v6 }
 0xaa6   :  { %v4288_v12 = vpop.f32.mrf.mxu1 }
 0xaa7   :  { %v2043_v13 = vmul.f32 0.7978846, %v2039_v10  ;;  %v2038_v14 = vadd.f32 %v2034_v11, %v2004_v6  ;;  %v2019_v15 = vadd.f32 %v4288_v12, %v3890_v21 }
 0xaa8   :  { %v2013_v16 = vpop.f32.mrf.mxu1 }
 0xaa9   :  { %4531 = vtanh.f32 %v2043_v13  ;;  %v2029_v17 = vmul.f32 0.044715, %v2019_v15  ;;  %v2014_v18 = vadd.f32 %v3890_v21, %v2013_v16  ;;  %v2042_v20 = vmul.f32 0.7978846, %v2038_v14 }
 0xaaa   :  { %v2025_v51 = vmul.f32 0.5, %v2019_v15 }
 0xaab   :  { %v2033_v22 = vmul.f32 %v2029_v17, %v2019_v15  ;;  %v2028_v24 = vmul.f32 0.044715, %v2014_v18  ;;  %4533 = vtanh.f32 %v2042_v20  ;;  %v2024_v40 = vmul.f32 0.5, %v2014_v18 }
 0xaad   :  { %v2037_v25 = vmul.f32 %v2033_v22, %v2019_v15  ;;  %v2032_v26 = vmul.f32 %v2028_v24, %v2014_v18 }
 0xaaf   :  { %v2041_v27 = vadd.f32 %v2037_v25, %v2019_v15  ;;  %v2036_v28 = vmul.f32 %v2032_v26, %v2014_v18  ;;  %v2235_v26 = vld [vmem:[#allocation2 + $0xb8] sm:$0xff] }
 0xab0   :  { %4311 = vmatprep.subr.mxu1 %v2235_v26 }
 0xab1   :  { %v2040_v29 = vadd.f32 %v2036_v28, %v2014_v18  ;;  %v2045_v30 = vmul.f32 0.7978846, %v2041_v27  ;;  %v2234_v27 = vld [vmem:[#allocation2 + $0xb0] sm:$0xff]  ;;  %4312 = vmatpush3.msra.mxu1 %v2235_v26  ;;  %v2233_v28 = vld [vmem:[#allocation2 + $0xa8] sm:$0xff] }
 0xab2   :  { %4313 = vmatprep.subr.mxu1 %v2234_v27 }
 0xab3   :  { %v2044_v32 = vmul.f32 0.7978846, %v2040_v29  ;;  %4535 = vtanh.f32 %v2045_v30  ;;  %4314 = vmatpush3.msra.mxu1 %v2234_v27  ;;  %v2232_v29 = vld [vmem:[#allocation2 + $0xa0] sm:$0xff] }
 0xab4   :  { %4315 = vmatprep.subr.mxu1 %v2233_v28 }
 0xab5   :  { %4537 = vtanh.f32 %v2044_v32  ;;  %4316 = vmatpush3.msra.mxu1 %v2233_v28 }
 0xab6   :  { %v4532_v37 = vpop.eup %4531  ;;  %4317 = vmatprep.subr.mxu1 %v2232_v29 }
 0xab7   :  { %v2051_v38 = vadd.f32 1.0, %v4532_v37  ;;  %4318 = vmatpush3.msra.mxu1 %v2232_v29 }
 0xab8   :  { %v4534_v39 = vpop.eup %4533 }
 0xab9   :  { %v2050_v43 = vadd.f32 1.0, %v4534_v39  ;;  %v2055_v31 = vmul.f32 %v2051_v38, %v2023_v45 }
 0xabb   :  { %v2054_v36 = vmul.f32 %v2050_v43, %v2022_v41 }
 0xabd   :  { %4305 = vmatprep.mubr.msk.f32.mxu0 %vm135_vm6, %v2054_v36 }
 0xabe   :  { %4306 = vmatmul.mubr.msk.f32.vlgmr.msra.gmra.mxu0 %vm135_vm6, %v2055_v31 }
 0xac0   :  { %v4536_v47 = vpop.eup %4535 }
 0xac1   :  { %v2053_v48 = vadd.f32 1.0, %v4536_v47 }
 0xac2   :  { %v4538_v35 = vpop.eup %4537 }
 0xac3   :  { %v2052_v42 = vadd.f32 1.0, %v4538_v35  ;;  %v2057_v53 = vmul.f32 %v2053_v48, %v2025_v51 }
 0xac5   :  { %v2056_v52 = vmul.f32 %v2052_v42, %v2024_v40  ;;  %v3900_v42 = vld [vmem:[#allocation6 + $0xe] ss:$0 sm:$0xff] }
 0xac7   :  { %4308 = vmatprep.mubr.msk.f32.mxu0 %vm135_vm6, %v2056_v52 }
 0xac8   :  { %4309 = vmatmul.mubr.msk.f32.gmra.mxu0 %vm135_vm6, %v2057_v53 }
 0xb7e   :  { %v4307_v56 = vpop.f32.mrf.mxu0 }
 0xb7f   :  { %v2146_v58 = vadd.f32 %v4307_v56, %v3895_v55 }
 0xb80   :  { %v2140_v59 = vpop.f32.mrf.mxu0 }
 0xb81   :  { %v2141_v60 = vadd.f32 %v3895_v55, %v2140_v59  ;;  %v2160_v1 = vadd.f32 %v2146_v58, %v5032_v50 }
 0xb83   :  { %v2166_v61 = vsel %vm233_vm11, %v2160_v1, 0.0  ;;  %v2159_v63 = vadd.f32 %v2141_v60, %v5030_v49 }
 0xb84   :  { %2167 = vadd.xlane.f32.xlu0 %v2166_v61 }
 0xb85   :  { %v2163_v62 = vsel %vm233_vm11, %v2159_v63, 0.0 }
 0xb86   :  { %2164 = vadd.xlane.f32.xlu1 %v2163_v62 }
 0xb88   :  { %v4310_v23 = vpop.f32.mrf.mxu0 }
 0xb89   :  { %v2156_v21 = vadd.f32 %v4310_v23, %v3895_v55 }
 0xb8a   :  { %v2150_v0 = vpop.f32.mrf.mxu0 }
 0xb8b   :  { %v2151_v2 = vadd.f32 %v3895_v55, %v2150_v0  ;;  %v2162_v3 = vadd.f32 %v2156_v21, %v5042_v57  ;;  %v3901_v55 = vld [vmem:[#allocation6 + $0xf] ss:$0 sm:$0xff] }
 0xb8d   :  { %v2172_v5 = vsel %vm233_vm11, %v2162_v3, 0.0  ;;  %v2161_v6 = vadd.f32 %v2151_v2, %v5038_v54  ;;  %v3902_v2 = vld [vmem:[#allocation6 + $0x10] ss:$0 sm:$0xff] }
 0xb8e   :  { %2173 = vadd.xlane.f32.xlu0 %v2172_v5 }
 0xb8f   :  { %v2169_v50 = vsel %vm233_vm11, %v2161_v6, 0.0 }
 0xb90   :  { %2170 = vadd.xlane.f32.xlu1 %v2169_v50 }
 0xc0d   :  { %v2168_v4 = vpop.xlane.xlu0 %2167 }
 0xc0e   :  { %v2176_v49 = vmul.f32 0.03125, %v2168_v4 }
 0xc0f   :  { %v2165_v8 = vpop.xlane.xlu1 %2164 }
 0xc10   :  { %v2180_v9 = vsub.f32 %v2160_v1, %v2176_v49  ;;  %v2175_v7 = vmul.f32 0.03125, %v2165_v8 }
 0xc12   :  { %v2179_v10 = vsub.f32 %v2159_v63, %v2175_v7  ;;  %v2184_v11 = vmul.f32 %v2180_v9, %v2180_v9 }
 0xc14   :  { %v2190_v12 = vsel %vm233_vm11, %v2184_v11, 0.0  ;;  %v2183_v13 = vmul.f32 %v2179_v10, %v2179_v10 }
 0xc15   :  { %2191 = vadd.xlane.f32.xlu0 %v2190_v12 }
 0xc16   :  { %v2187_v57 = vsel %vm233_vm11, %v2183_v13, 0.0 }
 0xc17   :  { %2188 = vadd.xlane.f32.xlu1 %v2187_v57  ;;  %v2174_v14 = vpop.xlane.xlu0 %2173 }
 0xc18   :  { %v2178_v54 = vmul.f32 0.03125, %v2174_v14 }
 0xc19   :  { %v2171_v15 = vpop.xlane.xlu1 %2170 }
 0xc1a   :  { %v2182_v16 = vsub.f32 %v2162_v3, %v2178_v54  ;;  %v2177_v17 = vmul.f32 0.03125, %v2171_v15 }
 0xc1c   :  { %v2181_v18 = vsub.f32 %v2161_v6, %v2177_v17  ;;  %v2186_v20 = vmul.f32 %v2182_v16, %v2182_v16 }
 0xc1e   :  { %v2196_v22 = vsel %vm233_vm11, %v2186_v20, 0.0  ;;  %v2185_v24 = vmul.f32 %v2181_v18, %v2181_v18 }
 0xc1f   :  { %2197 = vadd.xlane.f32.xlu0 %v2196_v22 }
 0xc20   :  { %v2193_v25 = vsel %vm233_vm11, %v2185_v24, 0.0 }
 0xc21   :  { %2194 = vadd.xlane.f32.xlu1 %v2193_v25 }
 0xc9e   :  { %v2192_v30 = vpop.xlane.xlu0 %2191 }
 0xc9f   :  { %v2200_v32 = vmul.f32 0.03125, %v2192_v30 }
 0xca0   :  { %v2189_v37 = vpop.xlane.xlu1 %2188 }
 0xca1   :  { %v2204_v39 = vadd.f32 1e-05, %v2200_v32  ;;  %v2199_v38 = vmul.f32 0.03125, %v2189_v37 }
 0xca3   :  { %4539 = vrsqrt.f32 %v2204_v39  ;;  %v2203_v41 = vadd.f32 1e-05, %v2199_v38 }
 0xca5   :  { %4541 = vrsqrt.f32 %v2203_v41 }
 0xca8   :  { %v2198_v43 = vpop.xlane.xlu0 %2197 }
 0xca9   :  { %v2202_v45 = vmul.f32 0.03125, %v2198_v43 }
 0xcaa   :  { %v2195_v36 = vpop.xlane.xlu1 %2194 }
 0xcab   :  { %v2206_v31 = vadd.f32 1e-05, %v2202_v45  ;;  %v2201_v47 = vmul.f32 0.03125, %v2195_v36 }
 0xcad   :  { %4543 = vrsqrt.f32 %v2206_v31  ;;  %v2205_v35 = vadd.f32 1e-05, %v2201_v47 }
 0xcaf   :  { %4545 = vrsqrt.f32 %v2205_v35 }
 0xcb0   :  { %v4540_v48 = vpop.eup %4539 }
 0xcb1   :  { %v2212_v40 = vmul.f32 %v4540_v48, %v2180_v9 }
 0xcb2   :  { %v4542_v51 = vpop.eup %4541 }
 0xcb3   :  { %v2211_v52 = vmul.f32 %v4542_v51, %v2179_v10  ;;  %v2220_v53 = vmul.f32 %v3900_v42, %v2212_v40 }
 0xcb5   :  { %v2219_v56 = vmul.f32 %v3900_v42, %v2211_v52  ;;  %v5064_v59 = vadd.f32 %v3901_v55, %v2220_v53 }
 0xcb7   :  { %v5062_v58 = vadd.f32 %v3901_v55, %v2219_v56 }
 0xcb9   :  { %4319 = vmatprep.mubr.msk.f32.mxu1 %vm233_vm11, %v5062_v58 }
 0xcba   :  { %v4544_v60 = vpop.eup %4543  ;;  %4320 = vmatmul.mubr.msk.f32.vlgmr.msra.gmra.mxu1 %vm233_vm11, %v5064_v59 }
 0xcbb   :  { %v2214_v1 = vmul.f32 %v4544_v60, %v2182_v16 }
 0xcbc   :  { %v4546_v61 = vpop.eup %4545 }
 0xcbd   :  { %v2213_v63 = vmul.f32 %v4546_v61, %v2181_v18  ;;  %v2222_v62 = vmul.f32 %v3900_v42, %v2214_v1 }
 0xcbf   :  { %v2221_v23 = vmul.f32 %v3900_v42, %v2213_v63  ;;  %v5072_v0 = vadd.f32 %v3901_v55, %v2222_v62 }
 0xcc1   :  { %v5070_v21 = vadd.f32 %v3901_v55, %v2221_v23 }
 0xcc3   :  { %4322 = vmatprep.mubr.msk.f32.mxu1 %vm233_vm11, %v5070_v21 }
 0xcc4   :  { %4323 = vmatmul.mubr.msk.f32.gmra.mxu1 %vm233_vm11, %v5072_v0 }
 0xd7a   :  { %v4321_v3 = vpop.f32.mrf.mxu1 }
 0xd7b   :  { %v5078_v5 = vadd.f32 %v4321_v3, %v3902_v2 }
 0xd7c   :  { %v2342_v6 = vpop.f32.mrf.mxu1 }
 0xd7d   :  { %v5080_v50 = vadd.f32 %v3902_v2, %v2342_v6  ;;  %2367 = vrot.lane.b32.xlu1 %v5078_v5, %s4674_s2 }
 0xd7f   :  { %2365 = vrot.lane.b32.xlu0 %v5080_v50, %s4674_s2  ;;  %4329 = vmatprep.mubr.msk.f32.mxu1 %vm383_vm3, %v5080_v50 }
 0xd83   :  { %2375 = vrot.lane.b32.xlu0 %v5078_v5, %s4675_s27 }
 0xd84   :  { %v4324_v4 = vpop.f32.mrf.mxu1 }
 0xd85   :  { %v5090_v49 = vadd.f32 %v4324_v4, %v3902_v2 }
 0xd86   :  { %v2352_v8 = vpop.f32.mrf.mxu1 }
 0xd87   :  { %v5092_v9 = vadd.f32 %v3902_v2, %v2352_v8  ;;  %2462 = vrot.lane.b32.xlu0 %v5090_v49, %s4675_s27  ;;  %2371 = vrot.lane.b32.xlu1 %v5090_v49, %s4674_s2 }
 0xd89   :  { %4336 = vmatprep.mubr.msk.f32.mxu0 %vm383_vm3, %v5092_v9 }
 0xd8b   :  { %2369 = vrot.lane.b32.xlu1 %v5092_v9, %s4674_s2 }
 0xd8f   :  { %2373 = vrot.lane.b32.xlu1 %v5080_v50, %s4675_s27 }
 0xd93   :  { %2460 = vrot.lane.b32.xlu1 %v5092_v9, %s4675_s27 }
 0xdef   :  { %v5106_v7 = vpop.permute.xlu1 %2367 }
 0xdf0   :  { %2549 = vrot.lane.b32.xlu0 %v5106_v7, %s4675_s27 }
 0xdf1   :  { %v5110_v10 = vpop.permute.xlu0 %2365 }
 0xdf2   :  { %2547 = vrot.lane.b32.xlu1 %v5110_v10, %s4675_s27 }
 0xdf5   :  { %v2376_v11 = vpop.permute.xlu0 %2375 }
 0xdf6   :  { %4325 = vmatprep.subr.msk.mxu1 %vm383_vm3, %v2376_v11 }
 0xdf7   :  { %4326 = vmatpush3.xpose.msk.msra.mxu1 %vm383_vm3, %v2376_v11 }
 0xdf9   :  { %v5116_v12 = vpop.permute.xlu1 %2371  ;;  %v2463_v13 = vpop.permute.xlu0 %2462 }
 0xdfa   :  { %2636 = vrot.lane.b32.xlu0 %v5116_v12, %s4675_s27  ;;  %4332 = vmatprep.subr.msk.mxu0 %vm383_vm3, %v2463_v13 }
 0xdfb   :  { %4333 = vmatpush3.xpose.msk.msra.mxu0 %vm383_vm3, %v2463_v13 }
 0xdfd   :  { %v5122_v57 = vpop.permute.xlu1 %2369 }
 0xdfe   :  { %2634 = vrot.lane.b32.xlu1 %v5122_v57, %s4675_s27 }
 0xe01   :  { %v2374_v14 = vpop.permute.xlu1 %2373 }
 0xe02   :  { %4327 = vmatprep.subr.msk.mxu1 %vm383_vm3, %v2374_v14 }
 0xe03   :  { %4328 = vmatpush3.xpose.msk.msra.mxu1 %vm383_vm3, %v2374_v14 }
 0xe05   :  { %v2461_v54 = vpop.permute.xlu1 %2460 }
 0xe06   :  { %4330 = vmatmul.mubr.msk.f32.vlgmr.msra.gmra.mxu1 %vm383_vm3, %v5078_v5  ;;  %4334 = vmatprep.subr.msk.mxu0 %vm383_vm3, %v2461_v54 }
 0xe07   :  { %4335 = vmatpush3.xpose.msk.msra.mxu0 %vm383_vm3, %v2461_v54  ;;  %4343 = vmatprep.mubr.msk.f32.mxu1 %vm383_vm3, %v5110_v10 }
 0xe0a   :  { %4337 = vmatmul.mubr.msk.f32.vlgmr.msra.gmra.mxu0 %vm383_vm3, %v5090_v49 }
 0xe0b   :  { %4350 = vmatprep.mubr.msk.f32.mxu0 %vm383_vm3, %v5122_v57 }
 0xe62   :  { %v2550_v15 = vpop.permute.xlu0 %2549 }
 0xe63   :  { %4339 = vmatprep.subr.msk.mxu1 %vm383_vm3, %v2550_v15 }
 0xe64   :  { %v2548_v16 = vpop.permute.xlu1 %2547  ;;  %4340 = vmatpush3.xpose.msk.msra.mxu1 %vm383_vm3, %v2550_v15 }
 0xe65   :  { %4341 = vmatprep.subr.msk.mxu1 %vm383_vm3, %v2548_v16 }
 0xe68   :  { %4342 = vmatpush3.xpose.msk.msra.mxu1 %vm383_vm3, %v2548_v16 }
 0xe6b   :  { %4344 = vmatmul.mubr.msk.f32.vlgmr.msra.gmra.mxu1 %vm383_vm3, %v5106_v7 }
 0xe6c   :  { %v2637_v17 = vpop.permute.xlu0 %2636 }
 0xe6d   :  { %4346 = vmatprep.subr.msk.mxu0 %vm383_vm3, %v2637_v17 }
 0xe6e   :  { %4347 = vmatpush3.xpose.msk.msra.mxu0 %vm383_vm3, %v2637_v17 }
 0xe70   :  { %v2635_v18 = vpop.permute.xlu1 %2634 }
 0xe71   :  { %4348 = vmatprep.subr.msk.mxu0 %vm383_vm3, %v2635_v18 }
 0xe72   :  { %4349 = vmatpush3.xpose.msk.msra.mxu0 %vm383_vm3, %v2635_v18 }
 0xe75   :  { %4351 = vmatmul.mubr.msk.f32.vlgmr.msra.gmra.mxu0 %vm383_vm3, %v5116_v12 }
 0xec6   :  { %v4331_v20 = vpop.f32.mrf.mxu1 }
 0xec7   :  { %v2457_v22 = vadd.f32 %v4331_v20, %v4932_v33 }
 0xec8   :  { %v2451_v24 = vpop.f32.mrf.mxu1 }
 0xec9   :  { %v2452_v25 = vadd.f32 %v2451_v24, %v4934_v34  ;;  %v2724_v26 = vsel %vm383_vm3, %v2457_v22, -inf }
 0xeca   :  { %2725 = vmax.xlane.f32.xlu1 %v2724_v26  ;;  %v4338_v27 = vpop.f32.mrf.mxu0 }
 0xecb   :  { %v2544_v28 = vadd.f32 %v4338_v27, %v4943_v46  ;;  %v2721_v29 = vsel %vm383_vm3, %v2452_v25, -inf }
 0xecc   :  { %2722 = vmax.xlane.f32.xlu0 %v2721_v29  ;;  %v2538_v30 = vpop.f32.mrf.mxu0 }
 0xecd   :  { %v2539_v32 = vadd.f32 %v2538_v30, %v4939_v44  ;;  %v2730_v37 = vsel %vm383_vm3, %v2544_v28, -inf }
 0xece   :  { %2731 = vmax.xlane.f32.xlu1 %v2730_v37 }
 0xecf   :  { %v2727_v39 = vsel %vm383_vm3, %v2539_v32, -inf }
 0xed0   :  { %2728 = vmax.xlane.f32.xlu0 %v2727_v39 }
 0xf2b   :  { %v4345_v38 = vpop.f32.mrf.mxu1 }
 0xf2c   :  { %v2631_v45 = vadd.f32 %v4345_v38, %v4932_v33 }
 0xf2d   :  { %v2625_v41 = vpop.f32.mrf.mxu1 }
 0xf2e   :  { %v2626_v43 = vadd.f32 %v2625_v41, %v4934_v34  ;;  %v2736_v31 = vsel %vm383_vm3, %v2631_v45, -inf }
 0xf30   :  { %v2733_v36 = vsel %vm383_vm3, %v2626_v43, -inf }
 0xf31   :  { %2734 = vmax.xlane.f32.xlu0 %v2733_v36 }
 0xf35   :  { %2737 = vmax.xlane.f32.xlu0 %v2736_v31  ;;  %v4352_v47 = vpop.f32.mrf.mxu0 }
 0xf36   :  { %v2718_v35 = vadd.f32 %v4352_v47, %v4943_v46 }
 0xf37   :  { %v2712_v48 = vpop.f32.mrf.mxu0 }
 0xf38   :  { %v2713_v40 = vadd.f32 %v2712_v48, %v4939_v44  ;;  %v2742_v42 = vsel %vm383_vm3, %v2718_v35, -inf }
 0xf39   :  { %2743 = vmax.xlane.f32.xlu0 %v2742_v42 }
 0xf3a   :  { %v2739_v51 = vsel %vm383_vm3, %v2713_v40, -inf }
 0xf3b   :  { %2740 = vmax.xlane.f32.xlu1 %v2739_v51  ;;  %v2237_v51 = vld [vmem:[#allocation2 + $0xc8] sm:$0xff] }
 0xf4c   :  { %2811 = vrot.lane.b32.xlu1 %v5078_v5, %s4676_s28 }
 0xf4f   :  { %2809 = vrot.lane.b32.xlu0 %v5080_v50, %s4676_s28 }
 0xf50   :  { %2898 = vrot.lane.b32.xlu1 %v5090_v49, %s4676_s28 }
 0xf53   :  { %2896 = vrot.lane.b32.xlu0 %v5092_v9, %s4676_s28  ;;  %v2726_v33 = vpop.xlane.xlu1 %2725 }
 0xf54   :  { %2985 = vrot.lane.b32.xlu1 %v5106_v7, %s4676_s28  ;;  %v2746_v34 = vsub.f32 %v2457_v22, %v2726_v33 }
 0xf55   :  { %v2723_v46 = vpop.xlane.xlu0 %2722 }
 0xf56   :  { %v2755_v44 = vmul.f32 1.442695, %v2746_v34  ;;  %v2745_v52 = vsub.f32 %v2452_v25, %v2723_v46 }
 0xf57   :  { %v2732_v53 = vpop.xlane.xlu1 %2731 }
 0xf58   :  { %2983 = vrot.lane.b32.xlu1 %v5110_v10, %s4676_s28  ;;  %4547 = vpow2.f32 %v2755_v44  ;;  %v2753_v55 = vmul.f32 1.442695, %v2745_v52  ;;  %v2748_v56 = vsub.f32 %v2544_v28, %v2732_v53 }
 0xf59   :  { %v2729_v60 = vpop.xlane.xlu0 %2728 }
 0xf5a   :  { %4549 = vpow2.f32 %v2753_v55  ;;  %v2759_v1 = vmul.f32 1.442695, %v2748_v56  ;;  %v2747_v61 = vsub.f32 %v2539_v32, %v2729_v60 }
 0xf5c   :  { %4551 = vpow2.f32 %v2759_v1  ;;  %v2757_v62 = vmul.f32 1.442695, %v2747_v61 }
 0xf5e   :  { %4553 = vpow2.f32 %v2757_v62  ;;  %v2236_v62 = vld [vmem:[#allocation2 + $0xc0] sm:$0xff] }
 0xf65   :  { %v5178_v63 = vpop.eup %4547 }
 0xf66   :  { %v2772_v23 = vsel %vm383_vm3, %v5178_v63, 0.0 }
 0xf67   :  { %v5182_v2 = vpop.eup %4549 }
 0xf68   :  { %v2769_v3 = vsel %vm383_vm3, %v5182_v2, 0.0 }
 0xf69   :  { %v5186_v5 = vpop.eup %4551 }
 0xf6a   :  { %v2778_v6 = vsel %vm383_vm3, %v5186_v5, 0.0 }
 0xf6b   :  { %v5190_v50 = vpop.eup %4553 }
 0xf6c   :  { %v2775_v4 = vsel %vm383_vm3, %v5190_v50, 0.0 }
 0xf72   :  { %2773 = vadd.xlane.f32.xlu0 %v2772_v23 }
 0xf7c   :  { %2770 = vadd.xlane.f32.xlu1 %v2769_v3  ;;  %v2239_v3 = vld [vmem:[#allocation2 + $0xd8] sm:$0xff] }
 0xf80   :  { %2779 = vadd.xlane.f32.xlu1 %v2778_v6 }
 0xf84   :  { %2776 = vadd.xlane.f32.xlu1 %v2775_v4 }
 0xfba   :  { %v2735_v49 = vpop.xlane.xlu0 %2734 }
 0xfbb   :  { %v2749_v8 = vsub.f32 %v2626_v43, %v2735_v49 }
 0xfbd   :  { %v2761_v10 = vmul.f32 1.442695, %v2749_v8 }
 0xfbe   :  { %v2738_v9 = vpop.xlane.xlu0 %2737 }
 0xfbf   :  { %v2750_v7 = vsub.f32 %v2631_v45, %v2738_v9 }
 0xfc1   :  { %v2763_v11 = vmul.f32 1.442695, %v2750_v7 }
 0xfc2   :  { %v2744_v13 = vpop.xlane.xlu0 %2743 }
 0xfc3   :  { %4555 = vpow2.f32 %v2763_v11  ;;  %v2752_v14 = vsub.f32 %v2718_v35, %v2744_v13  ;;  %v3935_v13 = vld [vmem:[#allocation6 + $0x11] ss:$0 sm:$0xff] }
 0xfc4   :  { %v2741_v54 = vpop.xlane.xlu1 %2740  ;;  %4557 = vpow2.f32 %v2761_v10 }
 0xfc5   :  { %v2767_v15 = vmul.f32 1.442695, %v2752_v14  ;;  %v2751_v16 = vsub.f32 %v2713_v40, %v2741_v54 }
 0xfc6   :  { %v2810_v18 = vpop.permute.xlu0 %2809 }
 0xfc7   :  { %v2765_v17 = vmul.f32 1.442695, %v2751_v16  ;;  %4559 = vpow2.f32 %v2767_v15 }
 0xfc8   :  { %v2812_v20 = vpop.permute.xlu1 %2811 }
 0xfc9   :  { %4561 = vpow2.f32 %v2765_v17  ;;  %4353 = vmatprep.subr.mxu1 %v2812_v20 }
 0xfca   :  { %4354 = vmatpush3.msra.mxu1 %v2812_v20  ;;  %v2897_v24 = vpop.permute.xlu0 %2896 }
 0xfcb   :  { %4355 = vmatprep.subr.mxu1 %v2810_v18 }
 0xfcc   :  { %v2899_v22 = vpop.permute.xlu1 %2898  ;;  %4356 = vmatpush3.msra.mxu1 %v2810_v18 }
 0xfcd   :  { %4360 = vmatprep.subr.mxu0 %v2899_v22 }
 0xfce   :  { %4361 = vmatpush3.msra.mxu0 %v2899_v22 }
 0xfcf   :  { %4362 = vmatprep.subr.mxu0 %v2897_v24 }
 0xfd0   :  { %v4556_v25 = vpop.eup %4555  ;;  %v2986_v26 = vpop.permute.xlu1 %2985  ;;  %4363 = vmatpush3.msra.mxu0 %v2897_v24 }
 0xfd1   :  { %4367 = vmatprep.subr.mxu1 %v2986_v26  ;;  %v2784_v27 = vsel %vm383_vm3, %v4556_v25, 0.0  ;;  %v4558_v28 = vpop.eup %4557 }
 0xfd2   :  { %2785 = vadd.xlane.f32.xlu0 %v2784_v27  ;;  %v2781_v30 = vsel %vm383_vm3, %v4558_v28, 0.0 }
 0xfd4   :  { %v4560_v29 = vpop.eup %4559  ;;  %v2984_v38 = vpop.permute.xlu1 %2983 }
 0xfd5   :  { %v2790_v39 = vsel %vm383_vm3, %v4560_v29, 0.0 }
 0xfd6   :  { %v4562_v32 = vpop.eup %4561  ;;  %2782 = vadd.xlane.f32.xlu0 %v2781_v30 }
 0xfd7   :  { %v2787_v37 = vsel %vm383_vm3, %v4562_v32, 0.0 }
 0xfd8   :  { %2788 = vadd.xlane.f32.xlu1 %v2787_v37 }
 0xfda   :  { %2791 = vadd.xlane.f32.xlu0 %v2790_v39 }
 0xfe9   :  { %3070 = vrot.lane.b32.xlu1 %v5122_v57, %s4676_s28 }
 0xff0   :  { %3072 = vrot.lane.b32.xlu0 %v5116_v12, %s4676_s28 }
 0xffb   :  { %v2774_v41 = vpop.xlane.xlu0 %2773 }
 0xffc   :  { %4563 = vrcp.f32 %v2774_v41 }
0x1005   :  { %v2771_v43 = vpop.xlane.xlu1 %2770 }
0x1006   :  { %4565 = vrcp.f32 %v2771_v43 }
0x1009   :  { %v2780_v45 = vpop.xlane.xlu1 %2779  ;;  %v4564_v31 = vpop.eup %4563 }
0x100a   :  { %4567 = vrcp.f32 %v2780_v45  ;;  %v2802_v48 = vmul.f32 %v4564_v31, %v5178_v63 }
0x100d   :  { %v2777_v36 = vpop.xlane.xlu1 %2776 }
0x100e   :  { %4569 = vrcp.f32 %v2777_v36 }
0x1013   :  { %v4566_v47 = vpop.eup %4565 }
0x1014   :  { %v2801_v35 = vmul.f32 %v4566_v47, %v5182_v2 }
0x1016   :  { %4357 = vmatprep.mubr.msk.f32.mxu1 %vm383_vm3, %v2801_v35 }
0x1017   :  { %4358 = vmatmul.mubr.msk.f32.vlgmr.msra.gmra.mxu1 %vm383_vm3, %v2802_v48  ;;  %v4568_v12 = vpop.eup %4567 }
0x1018   :  { %4368 = vmatpush3.msra.mxu1 %v2986_v26  ;;  %v2804_v42 = vmul.f32 %v4568_v12, %v5186_v5  ;;  %v2238_v5 = vld [vmem:[#allocation2 + $0xd0] sm:$0xff] }
0x1019   :  { %4369 = vmatprep.subr.mxu1 %v2984_v38 }
0x101a   :  { %4370 = vmatpush3.msra.mxu1 %v2984_v38 }
0x101b   :  { %v4570_v57 = vpop.eup %4569  ;;  %4381 = vmatprep.subr.mxu1 %v2237_v51 }
0x101c   :  { %v2803_v40 = vmul.f32 %v4570_v57, %v5190_v50 }
0x101e   :  { %4364 = vmatprep.mubr.msk.f32.mxu0 %vm383_vm3, %v2803_v40 }
0x101f   :  { %4365 = vmatmul.mubr.msk.f32.vlgmr.msra.gmra.mxu0 %vm383_vm3, %v2804_v42 }
0x105b   :  { %v2786_v33 = vpop.xlane.xlu0 %2785 }
0x105c   :  { %4571 = vrcp.f32 %v2786_v33 }
0x105f   :  { %v2783_v34 = vpop.xlane.xlu0 %2782 }
0x1060   :  { %4573 = vrcp.f32 %v2783_v34 }
0x1061   :  { %v2789_v44 = vpop.xlane.xlu1 %2788 }
0x1062   :  { %4575 = vrcp.f32 %v2789_v44 }
0x1063   :  { %v2792_v46 = vpop.xlane.xlu0 %2791 }
0x1064   :  { %4577 = vrcp.f32 %v2792_v46 }
0x1065   :  { %v3071_v53 = vpop.permute.xlu1 %3070 }
0x1067   :  { %v3073_v52 = vpop.permute.xlu0 %3072 }
0x1068   :  { %4374 = vmatprep.subr.mxu0 %v3073_v52 }
0x1069   :  { %4375 = vmatpush3.msra.mxu0 %v3073_v52  ;;  %v4572_v55 = vpop.eup %4571 }
0x106a   :  { %4376 = vmatprep.subr.mxu0 %v3071_v53  ;;  %v2806_v61 = vmul.f32 %v4572_v55, %v4556_v25 }
0x106b   :  { %4377 = vmatpush3.msra.mxu0 %v3071_v53 }
0x106c   :  { %4391 = vmatprep.subr.mxu0 %v2239_v3 }
0x106d   :  { %v4574_v56 = vpop.eup %4573 }
0x106e   :  { %v2805_v60 = vmul.f32 %v4574_v56, %v4558_v28  ;;  %v2243_v56 = vld [vmem:[#allocation2 + $0xf8] sm:$0xff] }
0x106f   :  { %v4576_v1 = vpop.eup %4575 }
0x1070   :  { %4371 = vmatprep.mubr.msk.f32.mxu1 %vm383_vm3, %v2805_v60  ;;  %v2807_v63 = vmul.f32 %v4576_v1, %v4562_v32  ;;  %v2242_v60 = vld [vmem:[#allocation2 + $0xf0] sm:$0xff]  ;;  %v2241_v1 = vld [vmem:[#allocation2 + $0xe8] sm:$0xff] }
0x1071   :  { %v4578_v23 = vpop.eup %4577  ;;  %4372 = vmatmul.mubr.msk.f32.vlgmr.msra.gmra.mxu1 %vm383_vm3, %v2806_v61  ;;  %v2240_v61 = vld [vmem:[#allocation2 + $0xe0] sm:$0xff] }
0x1072   :  { %4378 = vmatprep.mubr.msk.f32.mxu0 %vm383_vm3, %v2807_v63  ;;  %v2808_v2 = vmul.f32 %v4578_v23, %v4560_v29  ;;  %4382 = vmatpush3.msra.mxu1 %v2237_v51 }
0x1073   :  { %4383 = vmatprep.subr.mxu1 %v2236_v62 }
0x1074   :  { %4379 = vmatmul.mubr.msk.f32.vlgmr.msra.gmra.mxu0 %vm383_vm3, %v2808_v2  ;;  %4384 = vmatpush3.msra.mxu1 %v2236_v62 }
0x1075   :  { %4392 = vmatpush3.msra.mxu0 %v2239_v3  ;;  %4401 = vmatprep.subr.mxu1 %v2243_v56 }
0x1076   :  { %4393 = vmatprep.subr.mxu0 %v2238_v5 }
0x1077   :  { %4394 = vmatpush3.msra.mxu0 %v2238_v5 }
0x10d7   :  { %v4359_v6 = vpop.f32.mrf.mxu1 }
0x10d9   :  { %v2887_v50 = vpop.f32.mrf.mxu1 }
0x10da   :  { %4385 = vmatprep.mubr.msk.f32.mxu1 %vm383_vm3, %v2887_v50 }
0x10db   :  { %4386 = vmatmul.mubr.msk.f32.vlgmr.msra.gmra.mxu1 %vm383_vm3, %v4359_v6 }
0x10dc   :  { %4402 = vmatpush3.msra.mxu1 %v2243_v56 }
0x10dd   :  { %4403 = vmatprep.subr.mxu1 %v2242_v60 }
0x10de   :  { %4404 = vmatpush3.msra.mxu1 %v2242_v60 }
0x10df   :  { %v4366_v4 = vpop.f32.mrf.mxu0  ;;  %4405 = vmatprep.subr.mxu1 %v2241_v1 }
0x10e0   :  { %4406 = vmatpush3.msra.mxu1 %v2241_v1 }
0x10e1   :  { %v2974_v49 = vpop.f32.mrf.mxu0  ;;  %4407 = vmatprep.subr.mxu1 %v2240_v61 }
0x10e2   :  { %4388 = vmatprep.mubr.msk.f32.mxu1 %vm383_vm3, %v2974_v49  ;;  %4408 = vmatpush3.msra.mxu1 %v2240_v61 }
0x10e3   :  { %4389 = vmatmul.mubr.msk.f32.gmra.mxu1 %vm383_vm3, %v4366_v4  ;;  %4437 = vmatprep.subr.mxu1 %v4673_v19 }
0x1131   :  { %v4373_v8 = vpop.f32.mrf.mxu1 }
0x1133   :  { %v3061_v9 = vpop.f32.mrf.mxu1 }
0x1134   :  { %v4380_v7 = vpop.f32.mrf.mxu0  ;;  %4395 = vmatprep.mubr.msk.f32.mxu0 %vm383_vm3, %v3061_v9 }
0x1135   :  { %4396 = vmatmul.mubr.msk.f32.vlgmr.msra.gmra.mxu0 %vm383_vm3, %v4373_v8 }
0x1136   :  { %v3148_v10 = vpop.f32.mrf.mxu0 }
0x1137   :  { %4398 = vmatprep.mubr.msk.f32.mxu0 %vm383_vm3, %v3148_v10 }
0x1139   :  { %4399 = vmatmul.mubr.msk.f32.gmra.mxu0 %vm383_vm3, %v4380_v7  ;;  %vm3814_vm3 = vcmask 1024  }
0x119b   :  { %v4387_v11 = vpop.f32.mrf.mxu1 }
0x119c   :  { %v3259_v15 = vadd.f32 %v4387_v11, %v3935_v13  ;;  %v3940_v11 = vld [vmem:[#allocation6 + $0x12] ss:$0 sm:$0xff] }
0x119d   :  { %v3235_v14 = vpop.f32.mrf.mxu1 }
0x119e   :  { %v3258_v17 = vadd.f32 %v3935_v13, %v3235_v14 }
0x11a3   :  { %v4390_v54 = vpop.f32.mrf.mxu1 }
0x11a4   :  { %v3261_v27 = vadd.f32 %v4390_v54, %v3935_v13 }
0x11a5   :  { %v3245_v20 = vpop.f32.mrf.mxu1 }
0x11a6   :  { %v3260_v28 = vadd.f32 %v3935_v13, %v3245_v20 }
0x11f5   :  { %v4397_v16 = vpop.f32.mrf.mxu0 }
0x11f6   :  { %v3360_v18 = vadd.f32 %v4397_v16, %v3259_v15  ;;  %v3941_v15 = vld [vmem:[#allocation6 + $0x13] ss:$0 sm:$0xff] }
0x11f7   :  { %v3340_v22 = vpop.f32.mrf.mxu0 }
0x11f8   :  { %v3364_v24 = vadd.f32 %v3360_v18, %v5064_v59  ;;  %v3359_v25 = vadd.f32 %v3340_v22, %v3258_v17 }
0x11f9   :  { %v4400_v26 = vpop.f32.mrf.mxu0 }
0x11fa   :  { %v3363_v29 = vadd.f32 %v3359_v25, %v5062_v58  ;;  %v3370_v30 = vsel %vm233_vm11, %v3364_v24, 0.0  ;;  %v3362_v37 = vadd.f32 %v4400_v26, %v3261_v27 }
0x11fb   :  { %3371 = vadd.xlane.f32.xlu1 %v3370_v30  ;;  %v3350_v32 = vpop.f32.mrf.mxu0  ;;  %v2251_v30 = vld [vmem:[#allocation2 + $0x138] sm:$0xff] }
0x11fc   :  { %v3361_v39 = vadd.f32 %v3350_v32, %v3260_v28  ;;  %v3367_v38 = vsel %vm233_vm11, %v3363_v29, 0.0  ;;  %v3366_v43 = vadd.f32 %v3362_v37, %v5072_v0  ;;  %4415 = vmatprep.subr.mxu0 %v2251_v30  ;;  %v2250_v32 = vld [vmem:[#allocation2 + $0x130] sm:$0xff]  ;;  %v2249_v37 = vld [vmem:[#allocation2 + $0x128] sm:$0xff] }
0x11fd   :  { %3368 = vadd.xlane.f32.xlu0 %v3367_v38  ;;  %4416 = vmatpush3.msra.mxu0 %v2251_v30  ;;  %v2247_v38 = vld [vmem:[#allocation2 + $0x118] sm:$0xff] }
0x11fe   :  { %v3365_v41 = vadd.f32 %v3361_v39, %v5070_v21  ;;  %v3376_v45 = vsel %vm233_vm11, %v3366_v43, 0.0  ;;  %4417 = vmatprep.subr.mxu0 %v2250_v32  ;;  %v2248_v39 = vld [vmem:[#allocation2 + $0x120] sm:$0xff] }
0x11ff   :  { %4418 = vmatpush3.msra.mxu0 %v2250_v32 }
0x1200   :  { %v3373_v59 = vsel %vm233_vm11, %v3365_v41, 0.0  ;;  %4419 = vmatprep.subr.mxu0 %v2249_v37 }
0x1201   :  { %3374 = vadd.xlane.f32.xlu0 %v3373_v59  ;;  %4420 = vmatpush3.msra.mxu0 %v2249_v37  ;;  %v2244_v59 = vld [vmem:[#allocation2 + $0x100] sm:$0xff] }
0x1202   :  { %4421 = vmatprep.subr.mxu0 %v2248_v39 }
0x1203   :  { %4422 = vmatpush3.msra.mxu0 %v2248_v39 }
0x1204   :  { %4423 = vmatprep.subr.mxu0 %v2247_v38 }
0x1205   :  { %3377 = vadd.xlane.f32.xlu0 %v3376_v45  ;;  %4424 = vmatpush3.msra.mxu0 %v2247_v38  ;;  %v3942_v45 = vld [vmem:[#allocation6 + $0x14] ss:$0 sm:$0xff] }
0x1284   :  { %v3372_v58 = vpop.xlane.xlu1 %3371 }
0x1285   :  { %v3380_v36 = vmul.f32 0.03125, %v3372_v58 }
0x1286   :  { %v3369_v31 = vpop.xlane.xlu0 %3368 }
0x1287   :  { %v3384_v47 = vsub.f32 %v3364_v24, %v3380_v36  ;;  %v3379_v35 = vmul.f32 0.03125, %v3369_v31 }
0x1289   :  { %v3383_v48 = vsub.f32 %v3363_v29, %v3379_v35  ;;  %v3388_v12 = vmul.f32 %v3384_v47, %v3384_v47 }
0x128a   :  { %v3375_v57 = vpop.xlane.xlu0 %3374 }
0x128b   :  { %v3381_v40 = vmul.f32 0.03125, %v3375_v57  ;;  %v3394_v42 = vsel %vm233_vm11, %v3388_v12, 0.0  ;;  %v3387_v21 = vmul.f32 %v3383_v48, %v3383_v48 }
0x128c   :  { %3395 = vadd.xlane.f32.xlu0 %v3394_v42 }
0x128d   :  { %v3385_v0 = vsub.f32 %v3365_v41, %v3381_v40  ;;  %v3391_v51 = vsel %vm233_vm11, %v3387_v21, 0.0  ;;  %v2246_v41 = vld [vmem:[#allocation2 + $0x110] sm:$0xff] }
0x128e   :  { %3392 = vadd.xlane.f32.xlu1 %v3391_v51  ;;  %v3378_v33 = vpop.xlane.xlu0 %3377  ;;  %4425 = vmatprep.subr.mxu0 %v2246_v41 }
0x128f   :  { %v3382_v34 = vmul.f32 0.03125, %v3378_v33  ;;  %v3389_v44 = vmul.f32 %v3385_v0, %v3385_v0  ;;  %4426 = vmatpush3.msra.mxu0 %v2246_v41 }
0x1291   :  { %v3386_v46 = vsub.f32 %v3366_v43, %v3382_v34  ;;  %v3397_v52 = vsel %vm233_vm11, %v3389_v44, 0.0  ;;  %v2245_v43 = vld [vmem:[#allocation2 + $0x108] sm:$0xff] }
0x1292   :  { %3398 = vadd.xlane.f32.xlu1 %v3397_v52  ;;  %4427 = vmatprep.subr.mxu0 %v2245_v43 }
0x1293   :  { %v3390_v53 = vmul.f32 %v3386_v46, %v3386_v46  ;;  %4428 = vmatpush3.msra.mxu0 %v2245_v43 }
0x1294   :  { %4429 = vmatprep.subr.mxu0 %v2244_v59 }
0x1295   :  { %v3400_v55 = vsel %vm233_vm11, %v3390_v53, 0.0  ;;  %4430 = vmatpush3.msra.mxu0 %v2244_v59 }
0x1296   :  { %3401 = vadd.xlane.f32.xlu0 %v3400_v55 }
0x1315   :  { %v3396_v63 = vpop.xlane.xlu0 %3395 }
0x1316   :  { %v3404_v62 = vmul.f32 0.03125, %v3396_v63 }
0x1317   :  { %v3393_v23 = vpop.xlane.xlu1 %3392 }
0x1318   :  { %v3408_v2 = vadd.f32 1e-05, %v3404_v62  ;;  %v3403_v3 = vmul.f32 0.03125, %v3393_v23 }
0x131a   :  { %4579 = vrsqrt.f32 %v3408_v2  ;;  %v3407_v5 = vadd.f32 1e-05, %v3403_v3 }
0x131b   :  { %v3399_v6 = vpop.xlane.xlu1 %3398 }
0x131c   :  { %4581 = vrsqrt.f32 %v3407_v5  ;;  %v3405_v50 = vmul.f32 0.03125, %v3399_v6 }
0x131e   :  { %v3409_v4 = vadd.f32 1e-05, %v3405_v50 }
0x131f   :  { %v3402_v49 = vpop.xlane.xlu0 %3401 }
0x1320   :  { %4583 = vrsqrt.f32 %v3409_v4  ;;  %v3406_v8 = vmul.f32 0.03125, %v3402_v49 }
0x1322   :  { %v3410_v9 = vadd.f32 1e-05, %v3406_v8 }
0x1324   :  { %4585 = vrsqrt.f32 %v3410_v9 }
0x1327   :  { %v4580_v7 = vpop.eup %4579 }
0x1328   :  { %v3416_v10 = vmul.f32 %v4580_v7, %v3384_v47 }
0x1329   :  { %v4582_v13 = vpop.eup %4581 }
0x132a   :  { %v3415_v14 = vmul.f32 %v4582_v13, %v3383_v48  ;;  %v3424_v54 = vmul.f32 %v3940_v11, %v3416_v10 }
0x132c   :  { %v3423_v16 = vmul.f32 %v3940_v11, %v3415_v14  ;;  %v3432_v22 = vadd.f32 %v3941_v15, %v3424_v54 }
0x132d   :  { %v4584_v17 = vpop.eup %4583 }
0x132e   :  { %v5235_v18 = vadd.f32 %v3941_v15, %v3423_v16  ;;  %v3417_v20 = vmul.f32 %v4584_v17, %v3385_v0 }
0x1330   :  { %4409 = vmatprep.mubr.msk.f32.mxu1 %vm233_vm11, %v5235_v18  ;;  %v3425_v24 = vmul.f32 %v3940_v11, %v3417_v20  ;;  %v3947_v20 = vld [vmem:[#allocation6 + $0x15] ss:$0 sm:$0xff] }
0x1331   :  { %v4586_v25 = vpop.eup %4585  ;;  %4410 = vmatmul.mubr.msk.f32.vlgmr.msra.gmra.mxu1 %vm233_vm11, %v3432_v22 }
0x1332   :  { %v5240_v26 = vadd.f32 %v3941_v15, %v3425_v24  ;;  %v3418_v27 = vmul.f32 %v4586_v25, %v3386_v46 }
0x1334   :  { %4412 = vmatprep.mubr.msk.f32.mxu1 %vm233_vm11, %v5240_v26  ;;  %v3426_v28 = vmul.f32 %v3940_v11, %v3418_v27 }
0x1336   :  { %v3434_v29 = vadd.f32 %v3941_v15, %v3426_v28 }
0x1338   :  { %4413 = vmatmul.mubr.msk.f32.gmra.mxu1 %vm233_vm11, %v3434_v29 }
0x1339   :  { %4445 = vmatprep.mubr.msk.f32.mxu1 %vm4677_vm0, %v4673_v19 }
0x13f1   :  { %v4411_v58 = vpop.f32.mrf.mxu1 }
0x13f2   :  { %v3523_v36 = vadd.f32 %v4411_v58, %v3942_v45 }
0x13f3   :  { %v3517_v31 = vpop.f32.mrf.mxu1 }
0x13f4   :  { %v3541_v47 = vmul.f32 0.044715, %v3523_v36  ;;  %v3518_v35 = vadd.f32 %v3942_v45, %v3517_v31  ;;  %v3537_v49 = vmul.f32 0.5, %v3523_v36 }
0x13f6   :  { %v3545_v48 = vmul.f32 %v3541_v47, %v3523_v36  ;;  %v3540_v12 = vmul.f32 0.044715, %v3518_v35  ;;  %v3536_v50 = vmul.f32 0.5, %v3518_v35  ;;  %v3714_v47 = vld [vmem:[#allocation4 + $0x78] sm:$0xff] }
0x13f7   :  { %4438 = vmatpush3.msra.mxu1 %v3714_v47 }
0x13f8   :  { %v3549_v57 = vmul.f32 %v3545_v48, %v3523_v36  ;;  %v3544_v40 = vmul.f32 %v3540_v12, %v3518_v35  ;;  %v4414_v42 = vpop.f32.mrf.mxu1  ;;  %4439 = vmatprep.subr.mxu1 %v4673_v19  ;;  %v3711_v48 = vld [vmem:[#allocation4 + $0x60] sm:$0xff] }
0x13f9   :  { %v3533_v21 = vadd.f32 %v4414_v42, %v3942_v45 }
0x13fa   :  { %v3553_v0 = vadd.f32 %v3549_v57, %v3523_v36  ;;  %v3548_v51 = vmul.f32 %v3544_v40, %v3518_v35  ;;  %v3527_v33 = vpop.f32.mrf.mxu1 }
0x13fb   :  { %v3543_v34 = vmul.f32 0.044715, %v3533_v21  ;;  %v3528_v44 = vadd.f32 %v3942_v45, %v3527_v33  ;;  %v3539_v54 = vmul.f32 0.5, %v3533_v21 }
0x13fc   :  { %v3557_v46 = vmul.f32 0.7978846, %v3553_v0  ;;  %v3552_v52 = vadd.f32 %v3548_v51, %v3518_v35  ;;  %v3713_v35 = vld [vmem:[#allocation4 + $0x70] sm:$0xff] }
0x13fd   :  { %v3547_v53 = vmul.f32 %v3543_v34, %v3533_v21  ;;  %v3542_v55 = vmul.f32 0.044715, %v3528_v44  ;;  %v3538_v13 = vmul.f32 0.5, %v3528_v44  ;;  %4440 = vmatpush3.msra.mxu1 %v3713_v35 }
0x13fe   :  { %4587 = vtanh.f32 %v3557_v46  ;;  %v3556_v56 = vmul.f32 0.7978846, %v3552_v52  ;;  %4441 = vmatprep.subr.mxu1 %v4673_v19 }
0x13ff   :  { %v3551_v60 = vmul.f32 %v3547_v53, %v3533_v21  ;;  %v3546_v1 = vmul.f32 %v3542_v55, %v3528_v44  ;;  %v3953_v55 = vld [vmem:[#allocation6 + $0x17] ss:$0 sm:$0xff] }
0x1400   :  { %4589 = vtanh.f32 %v3556_v56 }
0x1401   :  { %v3555_v61 = vadd.f32 %v3551_v60, %v3533_v21  ;;  %v3550_v63 = vmul.f32 %v3546_v1, %v3528_v44 }
0x1403   :  { %v3554_v62 = vadd.f32 %v3550_v63, %v3528_v44  ;;  %v3559_v23 = vmul.f32 0.7978846, %v3555_v61  ;;  %v3952_v44 = vld [vmem:[#allocation6 + $0x16] ss:$0 sm:$0xff]  ;;  %v3954_v61 = vld [vmem:[#allocation6 + $0x3] ss:$0 sm:$0xff] }
0x1405   :  { %v3558_v2 = vmul.f32 0.7978846, %v3554_v62  ;;  %4591 = vtanh.f32 %v3559_v23 }
0x1407   :  { %4593 = vtanh.f32 %v3558_v2  ;;  %v3956_v2 = vld [vmem:[#allocation6 + $0x4] ss:$0 sm:$0xff] }
0x140b   :  { %v4588_v3 = vpop.eup %4587 }
0x140c   :  { %v3565_v6 = vadd.f32 1.0, %v4588_v3 }
0x140d   :  { %v4590_v5 = vpop.eup %4589 }
0x140e   :  { %v3564_v4 = vadd.f32 1.0, %v4590_v5  ;;  %v3569_v9 = vmul.f32 %v3565_v6, %v3537_v49 }
0x1410   :  { %v3568_v8 = vmul.f32 %v3564_v4, %v3536_v50  ;;  %v3957_v50 = vld [vmem:[#allocation6 + $0x5] ss:$0 sm:$0xff] }
0x1412   :  { %v4592_v7 = vpop.eup %4591  ;;  %4431 = vmatprep.mubr.msk.f32.mxu0 %vm135_vm6, %v3568_v8 }
0x1413   :  { %4432 = vmatmul.mubr.msk.f32.vlgmr.msra.gmra.mxu0 %vm135_vm6, %v3569_v9  ;;  %v3567_v11 = vadd.f32 1.0, %v4592_v7 }
0x1414   :  { %v4594_v10 = vpop.eup %4593 }
0x1415   :  { %v3566_v14 = vadd.f32 1.0, %v4594_v10  ;;  %v3571_v16 = vmul.f32 %v3567_v11, %v3539_v54 }
0x1417   :  { %v3570_v15 = vmul.f32 %v3566_v14, %v3538_v13 }
0x1419   :  { %4434 = vmatprep.mubr.msk.f32.mxu0 %vm135_vm6, %v3570_v15 }
0x141a   :  { %4435 = vmatmul.mubr.msk.f32.gmra.mxu0 %vm135_vm6, %v3571_v16 }
0x14d3   :  { %v4433_v17 = vpop.f32.mrf.mxu0 }
0x14d5   :  { %v3654_v22 = vpop.f32.mrf.mxu0 }
0x14d6   :  { %v3655_v24 = vadd.f32 %v3947_v20, %v3654_v22 }
0x14d8   :  { %v3671_v25 = vadd.f32 %v3655_v24, %v5235_v18 }
0x14da   :  { %v4436_v27 = vpop.f32.mrf.mxu0  ;;  %v3673_v28 = vsel %vm233_vm11, %v3671_v25, 0.0 }
0x14db   :  { %3674 = vadd.xlane.f32.xlu0 %v3673_v28 }
0x14dc   :  { %v3663_v29 = vpop.f32.mrf.mxu0 }
0x14dd   :  { %v3664_v30 = vadd.f32 %v3947_v20, %v3663_v29 }
0x14df   :  { %v3672_v32 = vadd.f32 %v3664_v30, %v5240_v26  ;;  %v3712_v26 = vld [vmem:[#allocation4 + $0x68] sm:$0xff] }
0x14e0   :  { %4442 = vmatpush3.msra.mxu1 %v3712_v26 }
0x14e1   :  { %v3676_v37 = vsel %vm233_vm11, %v3672_v32, 0.0  ;;  %4443 = vmatprep.subr.mxu1 %v4673_v19 }
0x14e2   :  { %3677 = vadd.xlane.f32.xlu1 %v3676_v37  ;;  %4444 = vmatpush3.msra.mxu1 %v3711_v48 }
0x1564   :  { %v3675_v39 = vpop.xlane.xlu0 %3674 }
0x1565   :  { %v3679_v38 = vmul.f32 0.03125, %v3675_v39 }
0x1567   :  { %v3681_v41 = vsub.f32 %v3671_v25, %v3679_v38 }
0x1569   :  { %v3683_v43 = vmul.f32 %v3681_v41, %v3681_v41 }
0x156b   :  { %v3678_v59 = vpop.xlane.xlu1 %3677  ;;  %v3685_v45 = vsel %vm233_vm11, %v3683_v43, 0.0 }
0x156c   :  { %v3680_v58 = vmul.f32 0.03125, %v3678_v59  ;;  %3686 = vadd.xlane.f32.xlu0 %v3685_v45 }
0x156e   :  { %v3682_v18 = vsub.f32 %v3672_v32, %v3680_v58 }
0x1570   :  { %v3684_v36 = vmul.f32 %v3682_v18, %v3682_v18 }
0x1572   :  { %v3688_v31 = vsel %vm233_vm11, %v3684_v36, 0.0 }
0x1573   :  { %3689 = vadd.xlane.f32.xlu1 %v3688_v31 }
0x15f5   :  { %v3687_v12 = vpop.xlane.xlu0 %3686 }
0x15f6   :  { %v3691_v57 = vmul.f32 0.03125, %v3687_v12 }
0x15f8   :  { %v3693_v40 = vadd.f32 1e-05, %v3691_v57 }
0x15fa   :  { %4595 = vrsqrt.f32 %v3693_v40 }
0x15fc   :  { %v3690_v42 = vpop.xlane.xlu1 %3689 }
0x15fd   :  { %v3692_v21 = vmul.f32 0.03125, %v3690_v42 }
0x15ff   :  { %v3694_v0 = vadd.f32 1e-05, %v3692_v21 }
0x1601   :  { %4597 = vrsqrt.f32 %v3694_v0 }
0x1607   :  { %v4596_v51 = vpop.eup %4595 }
0x1608   :  { %v3697_v33 = vmul.f32 %v4596_v51, %v3681_v41 }
0x160a   :  { %v3703_v52 = vmul.f32 %v3952_v44, %v3697_v33 }
0x160c   :  { %v3709_v19 = vadd.f32 %v3953_v55, %v3703_v52 }
0x160e   :  { %v4598_v34 = vpop.eup %4597 }
0x160f   :  { %v3698_v46 = vmul.f32 %v4598_v34, %v3682_v18 }
0x1611   :  { %v3704_v53 = vmul.f32 %v3952_v44, %v3698_v46 }
0x1613   :  { %v3710_v56 = vadd.f32 %v3953_v55, %v3704_v53 }
0x1615   :  { %v3722_v60 = vrot.slane %v3710_v56, 7 }
0x1617   :  { %v3724_v1 = vsel %vm3723_vm1, %v3722_v60, %v3709_v19 }
0x1618   :  { %4446 = vmatmul.mubr.msk.f32.vlgmr.msra.gmra.mxu1 %vm233_vm11, %v3724_v1 }
0x16d8   :  { %v3793_v63 = vpop.f32.mrf.mxu1 }
0x16d9   :  { %v3794_v62 = vadd.f32 %v3954_v61, %v3793_v63 }
0x16da   :  { %v4447_v23 = vpop.f32.mrf.mxu1 }
0x16db   :  { %4599 = vtanh.f32 %v3794_v62 }
0x16e8   :  { %v4600_v3 = vpop.eup %4599 }
0x16e9   :  { %v3803_v5 = vmul.f32 %v4600_v3, %v3956_v2 }
0x16eb   :  { %v3805_v6 = vsel %vm3804_vm2, %v3803_v5, 0.0 }
0x16ec   :  { %3806 = vadd.xlane.f32.xlu1 %v3805_v6 }
0x1775   :  { %v3807_v4 = vpop.xlane.xlu1 %3806 }
0x1776   :  { %v3813_v49 = vadd.f32 %v3957_v50, %v3807_v4 }
0x1778   :  { %3815 = vst.msk [vmem:[%s5269_s6] sm:$0x3] %vm3814_vm3, %v3813_v49 }
0x1779   :  { %3820 = vsyncpa [#allocation3], 1 }
0x177a   :  { %3821 = vsyncpa [#allocation5], 1 }

</bundles_post_ra>
